<compile_context>
chip_gen: v7x
topology: tpu7x:2x2x1
jax: 0.10.0
libtpu: 0.0.40
codegen_flags: <defaults>
</compile_context>

<pallas_src>
import numpy as np
import jax
import jax.numpy as jnp
from jax.experimental import pallas as pl
from jax.experimental.pallas import tpu as pltpu


def dsc_kernel(xp_ref, w_ref, out_ref):
    # xp_ref : [Hp, Wp, Cin]      bf16, zero-padded NHWC input for one image
    # w_ref  : [9, Cin, CoutP]    bf16, fused (depthwise x pointwise) per-tap weights
    # out_ref: [H*W, CoutP]       f32, lane-dense output slab
    Hp, Wp, Cin = xp_ref.shape
    H, W = Hp - 2, Wp - 2
    M, CoutP = out_ref.shape

    # Single load of the padded tile; all 9 shifted patches are built from this
    # value in VMEM/vregs (no HBM im2col, no per-tap dtype casts).
    x = xp_ref[...]

    acc = jnp.zeros((M, CoutP), dtype=jnp.float32)
    # Static, fully-unrolled 3x3 tap loop: one [M, Cin] x [Cin, CoutP] MXU
    # matmul per tap, accumulated in f32.
    # TODO(synk): for small Cin it would be ~9x fewer MXU pushes to concatenate
    # the 9 patches along the contraction dim (K = 9*Cin) and issue one dot;
    # kept as 9 dots here since the minor-dim concat lowering is riskier and
    # this path is proven on-device.
    for kh in range(3):
        for kw in range(3):
            patch = x[kh:kh + H, kw:kw + W, :].reshape(M, Cin)   # bf16 [M, Cin]
            acc = acc + jnp.dot(patch, w_ref[kh * 3 + kw],
                                preferred_element_type=jnp.float32)
    out_ref[...] = acc


def depthwise_separable_conv(x_nchw, wd, wp):
    """x_nchw: [N, Cin, H, W]; wd: [Cin, 1, 3, 3]; wp: [Cout, Cin, 1, 1] -> [N, Cout, H, W]."""
    N, Cin, H, W = x_nchw.shape
    Cout = wp.shape[0]
    Hp, Wp = H + 2, W + 2
    M = H * W
    CoutP = ((Cout + 127) // 128) * 128          # lane-dense output width

    # --- glue: NCHW -> NHWC, cast to bf16 (MXU operand dtype), pad=1 halo ---
    x_nhwc = jnp.transpose(x_nchw, (0, 2, 3, 1)).astype(jnp.bfloat16)
    xp = jnp.pad(x_nhwc, ((0, 0), (1, 1), (1, 1), (0, 0)))          # [N, Hp, Wp, Cin]

    # --- fuse depthwise and pointwise weights:  W[kh*3+kw, c, o] = wd[c,kh,kw] * wp[o,c] ---
    wd_ = wd[:, 0, :, :].astype(jnp.float32)                        # [Cin, 3, 3]
    wp_ = wp[:, :, 0, 0].astype(jnp.float32)                        # [Cout, Cin]
    wtap = jnp.einsum('ckl,oc->klco', wd_, wp_).reshape(9, Cin, Cout)
    wtap = jnp.pad(wtap, ((0, 0), (0, 0), (0, CoutP - Cout)))       # zero cols for padded channels
    wtap = wtap.astype(jnp.bfloat16)

    out = pl.pallas_call(
        dsc_kernel,
        grid=(N,),
        in_specs=[
            # one padded image per grid step (batch dim squeezed out)
            pl.BlockSpec((None, Hp, Wp, Cin), lambda n: (n, 0, 0, 0)),
            # fused weights, same block every step -> resident in VMEM
            pl.BlockSpec((9, Cin, CoutP), lambda n: (0, 0, 0)),
        ],
        out_specs=pl.BlockSpec((None, M, CoutP), lambda n: (n, 0, 0)),
        out_shape=jax.ShapeDtypeStruct((N, M, CoutP), jnp.float32),
        compiler_params=pltpu.CompilerParams(
            dimension_semantics=("parallel",),
            vmem_limit_bytes=32 * 1024 * 1024,
        ),
    )(xp, wtap)

    # --- glue: drop padded channels, back to NCHW ---
    out = out[:, :, :Cout].reshape(N, H, W, Cout)
    return jnp.transpose(out, (0, 3, 1, 2))
    # TODO(synk): for large H*W, add an H-tile grid axis with a 2-row halo
    # (element-indexed blocks or manual DMA); at these sizes one image per step
    # already gives TILE_M = H*W rows.


def reference_numpy(x, wd, wp):
    """float64 reference of the PyTorch forward (cross-correlation, pad=1)."""
    x = np.asarray(x, np.float64)
    wd = np.asarray(wd, np.float64)
    wp = np.asarray(wp, np.float64)
    N, Cin, H, W = x.shape
    xp = np.pad(x, ((0, 0), (0, 0), (1, 1), (1, 1)))
    dw = np.zeros((N, Cin, H, W), dtype=np.float64)
    for kh in range(3):
        for kw in range(3):
            dw += xp[:, :, kh:kh + H, kw:kw + W] * wd[:, 0, kh, kw][None, :, None, None]
    return np.einsum('nchw,oc->nohw', dw, wp[:, :, 0, 0])


if __name__ == "__main__":
    # Small shapes consistent with depthwise_separable_convx(nin=4, nout=8)
    N, Cin, Cout, H, W = 2, 4, 8, 16, 16

    key = jax.random.PRNGKey(0)
    kx, k1, k2 = jax.random.split(key, 3)
    x = jax.random.normal(kx, (N, Cin, H, W), dtype=jnp.float32)
    wd = jax.random.normal(k1, (Cin, 1, 3, 3), dtype=jnp.float32) * 0.3    # depthwise weight
    wp = jax.random.normal(k2, (Cout, Cin, 1, 1), dtype=jnp.float32) * 0.3  # pointwise weight

    out = jax.block_until_ready(depthwise_separable_conv(x, wd, wp))

    ref = reference_numpy(np.asarray(x), np.asarray(wd), np.asarray(wp))
    # bf16 MXU operands with f32 accumulation -> slightly loosened tolerance.
    np.testing.assert_allclose(np.asarray(out), ref, rtol=2e-2, atol=2e-2)

    print("KERNEL_OK")
</pallas_src>

<mosaic_0001>
module attributes {stable_mosaic.version = 11 : i64} {
  func.func @dsc_kernel(%arg0: i32, %arg1: memref<1x18x18x4xbf16, #tpu.memory_space<vmem>>, %arg2: memref<9x4x128xbf16, #tpu.memory_space<vmem>>, %arg3: memref<1x256x128xf32, #tpu.memory_space<vmem>>) attributes {dimension_semantics = [#tpu.dimension_semantics<parallel>], iteration_bounds = array<i64: 2>, scalar_prefetch = 0 : i64, scratch_operands = 0 : i64, tpu.core_type = #tpu.core_type<tc>, window_params = [{transform_indices = @transform_0, window_bounds = array<i64: 1, 18, 18, 4>}, {pipeline_mode = #tpu.pipeline_mode<synchronous>, transform_indices = @transform_1, window_bounds = array<i64: 9, 4, 128>}, {transform_indices = @transform_2, window_bounds = array<i64: 1, 256, 128>}]} {
    %c0 = arith.constant 0 : index
    %c0_0 = arith.constant 0 : index
    %c0_1 = arith.constant 0 : index
    %c0_2 = arith.constant 0 : index
    %0 = vector.load %arg1[%c0, %c0_0, %c0_1, %c0_2] : memref<1x18x18x4xbf16, #tpu.memory_space<vmem>>, vector<1x18x18x4xbf16>
    %1 = vector.shape_cast %0 : vector<1x18x18x4xbf16> to vector<18x18x4xbf16>
    %cst = arith.constant 0.000000e+00 : f32
    %2 = vector.broadcast %cst : f32 to vector<256x128xf32>
    %3 = vector.extract_strided_slice %1 {offsets = [0, 0, 0], sizes = [16, 16, 4], strides = [1, 1, 1]} : vector<18x18x4xbf16> to vector<16x16x4xbf16>
    %4 = vector.shape_cast %3 : vector<16x16x4xbf16> to vector<256x4xbf16>
    %c0_3 = arith.constant 0 : index
    %c0_4 = arith.constant 0 : index
    %c0_5 = arith.constant 0 : index
    %5 = vector.load %arg2[%c0_3, %c0_4, %c0_5] : memref<9x4x128xbf16, #tpu.memory_space<vmem>>, vector<1x4x128xbf16>
    %6 = vector.shape_cast %5 : vector<1x4x128xbf16> to vector<4x128xbf16>
    %cst_6 = arith.constant dense<0.000000e+00> : vector<256x128xf32>
    %7 = tpu.matmul %4, %6, %cst_6 {dimension_numbers = #tpu.dot_dimension_numbers<[1], [0], [0], [1], [0, 0, 1, 1], [], []>} : vector<256x4xbf16>, vector<4x128xbf16>, vector<256x128xf32> -> vector<256x128xf32>
    %8 = arith.addf %2, %7 : vector<256x128xf32>
    %9 = vector.extract_strided_slice %1 {offsets = [0, 1, 0], sizes = [16, 16, 4], strides = [1, 1, 1]} : vector<18x18x4xbf16> to vector<16x16x4xbf16>
    %10 = vector.shape_cast %9 : vector<16x16x4xbf16> to vector<256x4xbf16>
    %c1 = arith.constant 1 : index
    %c0_7 = arith.constant 0 : index
    %c0_8 = arith.constant 0 : index
    %11 = vector.load %arg2[%c1, %c0_7, %c0_8] : memref<9x4x128xbf16, #tpu.memory_space<vmem>>, vector<1x4x128xbf16>
    %12 = vector.shape_cast %11 : vector<1x4x128xbf16> to vector<4x128xbf16>
    %cst_9 = arith.constant dense<0.000000e+00> : vector<256x128xf32>
    %13 = tpu.matmul %10, %12, %cst_9 {dimension_numbers = #tpu.dot_dimension_numbers<[1], [0], [0], [1], [0, 0, 1, 1], [], []>} : vector<256x4xbf16>, vector<4x128xbf16>, vector<256x128xf32> -> vector<256x128xf32>
    %14 = arith.addf %8, %13 : vector<256x128xf32>
    %15 = vector.extract_strided_slice %1 {offsets = [0, 2, 0], sizes = [16, 16, 4], strides = [1, 1, 1]} : vector<18x18x4xbf16> to vector<16x16x4xbf16>
    %16 = vector.shape_cast %15 : vector<16x16x4xbf16> to vector<256x4xbf16>
    %c2 = arith.constant 2 : index
    %c0_10 = arith.constant 0 : index
    %c0_11 = arith.constant 0 : index
    %17 = vector.load %arg2[%c2, %c0_10, %c0_11] : memref<9x4x128xbf16, #tpu.memory_space<vmem>>, vector<1x4x128xbf16>
    %18 = vector.shape_cast %17 : vector<1x4x128xbf16> to vector<4x128xbf16>
    %cst_12 = arith.constant dense<0.000000e+00> : vector<256x128xf32>
    %19 = tpu.matmul %16, %18, %cst_12 {dimension_numbers = #tpu.dot_dimension_numbers<[1], [0], [0], [1], [0, 0, 1, 1], [], []>} : vector<256x4xbf16>, vector<4x128xbf16>, vector<256x128xf32> -> vector<256x128xf32>
    %20 = arith.addf %14, %19 : vector<256x128xf32>
    %21 = vector.extract_strided_slice %1 {offsets = [1, 0, 0], sizes = [16, 16, 4], strides = [1, 1, 1]} : vector<18x18x4xbf16> to vector<16x16x4xbf16>
    %22 = vector.shape_cast %21 : vector<16x16x4xbf16> to vector<256x4xbf16>
    %c3 = arith.constant 3 : index
    %c0_13 = arith.constant 0 : index
    %c0_14 = arith.constant 0 : index
    %23 = vector.load %arg2[%c3, %c0_13, %c0_14] : memref<9x4x128xbf16, #tpu.memory_space<vmem>>, vector<1x4x128xbf16>
    %24 = vector.shape_cast %23 : vector<1x4x128xbf16> to vector<4x128xbf16>
    %cst_15 = arith.constant dense<0.000000e+00> : vector<256x128xf32>
    %25 = tpu.matmul %22, %24, %cst_15 {dimension_numbers = #tpu.dot_dimension_numbers<[1], [0], [0], [1], [0, 0, 1, 1], [], []>} : vector<256x4xbf16>, vector<4x128xbf16>, vector<256x128xf32> -> vector<256x128xf32>
    %26 = arith.addf %20, %25 : vector<256x128xf32>
    %27 = vector.extract_strided_slice %1 {offsets = [1, 1, 0], sizes = [16, 16, 4], strides = [1, 1, 1]} : vector<18x18x4xbf16> to vector<16x16x4xbf16>
    %28 = vector.shape_cast %27 : vector<16x16x4xbf16> to vector<256x4xbf16>
    %c4 = arith.constant 4 : index
    %c0_16 = arith.constant 0 : index
    %c0_17 = arith.constant 0 : index
    %29 = vector.load %arg2[%c4, %c0_16, %c0_17] : memref<9x4x128xbf16, #tpu.memory_space<vmem>>, vector<1x4x128xbf16>
    %30 = vector.shape_cast %29 : vector<1x4x128xbf16> to vector<4x128xbf16>
    %cst_18 = arith.constant dense<0.000000e+00> : vector<256x128xf32>
    %31 = tpu.matmul %28, %30, %cst_18 {dimension_numbers = #tpu.dot_dimension_numbers<[1], [0], [0], [1], [0, 0, 1, 1], [], []>} : vector<256x4xbf16>, vector<4x128xbf16>, vector<256x128xf32> -> vector<256x128xf32>
    %32 = arith.addf %26, %31 : vector<256x128xf32>
    %33 = vector.extract_strided_slice %1 {offsets = [1, 2, 0], sizes = [16, 16, 4], strides = [1, 1, 1]} : vector<18x18x4xbf16> to vector<16x16x4xbf16>
    %34 = vector.shape_cast %33 : vector<16x16x4xbf16> to vector<256x4xbf16>
    %c5 = arith.constant 5 : index
    %c0_19 = arith.constant 0 : index
    %c0_20 = arith.constant 0 : index
    %35 = vector.load %arg2[%c5, %c0_19, %c0_20] : memref<9x4x128xbf16, #tpu.memory_space<vmem>>, vector<1x4x128xbf16>
    %36 = vector.shape_cast %35 : vector<1x4x128xbf16> to vector<4x128xbf16>
    %cst_21 = arith.constant dense<0.000000e+00> : vector<256x128xf32>
    %37 = tpu.matmul %34, %36, %cst_21 {dimension_numbers = #tpu.dot_dimension_numbers<[1], [0], [0], [1], [0, 0, 1, 1], [], []>} : vector<256x4xbf16>, vector<4x128xbf16>, vector<256x128xf32> -> vector<256x128xf32>
    %38 = arith.addf %32, %37 : vector<256x128xf32>
    %39 = vector.extract_strided_slice %1 {offsets = [2, 0, 0], sizes = [16, 16, 4], strides = [1, 1, 1]} : vector<18x18x4xbf16> to vector<16x16x4xbf16>
    %40 = vector.shape_cast %39 : vector<16x16x4xbf16> to vector<256x4xbf16>
    %c6 = arith.constant 6 : index
    %c0_22 = arith.constant 0 : index
    %c0_23 = arith.constant 0 : index
    %41 = vector.load %arg2[%c6, %c0_22, %c0_23] : memref<9x4x128xbf16, #tpu.memory_space<vmem>>, vector<1x4x128xbf16>
    %42 = vector.shape_cast %41 : vector<1x4x128xbf16> to vector<4x128xbf16>
    %cst_24 = arith.constant dense<0.000000e+00> : vector<256x128xf32>
    %43 = tpu.matmul %40, %42, %cst_24 {dimension_numbers = #tpu.dot_dimension_numbers<[1], [0], [0], [1], [0, 0, 1, 1], [], []>} : vector<256x4xbf16>, vector<4x128xbf16>, vector<256x128xf32> -> vector<256x128xf32>
    %44 = arith.addf %38, %43 : vector<256x128xf32>
    %45 = vector.extract_strided_slice %1 {offsets = [2, 1, 0], sizes = [16, 16, 4], strides = [1, 1, 1]} : vector<18x18x4xbf16> to vector<16x16x4xbf16>
    %46 = vector.shape_cast %45 : vector<16x16x4xbf16> to vector<256x4xbf16>
    %c7 = arith.constant 7 : index
    %c0_25 = arith.constant 0 : index
    %c0_26 = arith.constant 0 : index
    %47 = vector.load %arg2[%c7, %c0_25, %c0_26] : memref<9x4x128xbf16, #tpu.memory_space<vmem>>, vector<1x4x128xbf16>
    %48 = vector.shape_cast %47 : vector<1x4x128xbf16> to vector<4x128xbf16>
    %cst_27 = arith.constant dense<0.000000e+00> : vector<256x128xf32>
    %49 = tpu.matmul %46, %48, %cst_27 {dimension_numbers = #tpu.dot_dimension_numbers<[1], [0], [0], [1], [0, 0, 1, 1], [], []>} : vector<256x4xbf16>, vector<4x128xbf16>, vector<256x128xf32> -> vector<256x128xf32>
    %50 = arith.addf %44, %49 : vector<256x128xf32>
    %51 = vector.extract_strided_slice %1 {offsets = [2, 2, 0], sizes = [16, 16, 4], strides = [1, 1, 1]} : vector<18x18x4xbf16> to vector<16x16x4xbf16>
    %52 = vector.shape_cast %51 : vector<16x16x4xbf16> to vector<256x4xbf16>
    %c8 = arith.constant 8 : index
    %c0_28 = arith.constant 0 : index
    %c0_29 = arith.constant 0 : index
    %53 = vector.load %arg2[%c8, %c0_28, %c0_29] : memref<9x4x128xbf16, #tpu.memory_space<vmem>>, vector<1x4x128xbf16>
    %54 = vector.shape_cast %53 : vector<1x4x128xbf16> to vector<4x128xbf16>
    %cst_30 = arith.constant dense<0.000000e+00> : vector<256x128xf32>
    %55 = tpu.matmul %52, %54, %cst_30 {dimension_numbers = #tpu.dot_dimension_numbers<[1], [0], [0], [1], [0, 0, 1, 1], [], []>} : vector<256x4xbf16>, vector<4x128xbf16>, vector<256x128xf32> -> vector<256x128xf32>
    %56 = arith.addf %50, %55 : vector<256x128xf32>
    %c0_31 = arith.constant 0 : index
    %c0_32 = arith.constant 0 : index
    %c0_33 = arith.constant 0 : index
    %57 = vector.load %arg3[%c0_31, %c0_32, %c0_33] : memref<1x256x128xf32, #tpu.memory_space<vmem>>, vector<1x256x128xf32>
    %58 = vector.shape_cast %57 : vector<1x256x128xf32> to vector<256x128xf32>
    %59 = vector.shape_cast %56 : vector<256x128xf32> to vector<1x256x128xf32>
    tpu.vector_store %arg3[%c0_31, %c0_32, %c0_33], %59 {strides = array<i32>} : memref<1x256x128xf32, #tpu.memory_space<vmem>>, vector<1x256x128xf32>,
    return
  }
  func.func @transform_0(%arg0: i32) -> (i32, i32, i32, i32) {
    %c0_i32 = arith.constant 0 : i32
    %c0_i32_0 = arith.constant 0 : i32
    %c0_i32_1 = arith.constant 0 : i32
    %c0_i32_2 = arith.constant 0 : i32
    return %arg0, %c0_i32, %c0_i32_0, %c0_i32_1 : i32, i32, i32, i32
  }
  func.func @transform_1(%arg0: i32) -> (i32, i32, i32) {
    %c0_i32 = arith.constant 0 : i32
    %c0_i32_0 = arith.constant 0 : i32
    %c0_i32_1 = arith.constant 0 : i32
    %c0_i32_2 = arith.constant 0 : i32
    return %c0_i32, %c0_i32_0, %c0_i32_1 : i32, i32, i32
  }
  func.func @transform_2(%arg0: i32) -> (i32, i32, i32) {
    %c0_i32 = arith.constant 0 : i32
    %c0_i32_0 = arith.constant 0 : i32
    %c0_i32_1 = arith.constant 0 : i32
    return %arg0, %c0_i32, %c0_i32_0 : i32, i32, i32
  }
}

</mosaic_0001>

<bundles_post_ra>
// kernel: tpu_custom_call.1
= control target key start
LH: loop header
LB: loop body
LE: loop exit
PB: predicated region body
PF: predicated region fallthrough
CT: control target
= control target key end

     0   :  { %7 = vsyncpa [#allocation3], 0  ;;  %s5166_s0 = inlined_call_operand.vmem [shape: bf16[2,18,18,4], index: 0, kind: input, shape index: {}]   ;;  %s5167_s1 = inlined_call_operand.vmem [shape: bf16[9,4,128], index: 1, kind: input, shape index: {}]   ;;  %s5168_s2 = inlined_call_operand.hbm [shape: f32[2,256,128], index: 2, kind: output, shape index: {}]  }
   0x1   :  { %9 = vsyncpa [#allocation3 + $0x1], 0  ;;  %s4075_s9 = smov 0   ;;  %s4077_s10 = smov 0  }
   0x2   :  { %s4079_s11 = smov 0   ;;  %s4081_s12 = smov 0  }
   0x3 LB: > { %s4096_s13 = sadd.s32 4294967295, %s4055_s12   ;;  %s2966_s14 = sadd.s32 4294967294, %s4055_s12   ;;  %s4055_s12 = sphi %s4081_s12, %s5251_s12   ;;  %s4051_s11 = sphi %s4079_s11, %s5250_s11   ;;  %s4047_s10 = sphi %s4077_s10, %s5249_s10   ;;  %s4043_s9 = sphi %s4075_s9, %s5248_s9  }
   0x4   : > { %s4100_s15 = sadd.s32 1, %s4055_s12   ;;  %s69_s16 = sadd.s32 1, %s4051_s11 }
   0x5   : > { %s66_s17 = ssub.s32 %s4055_s12, %s4100_s15  ;;  %p79_p0 = scmp.ne.s32.totalorder %s4051_s11, %s4047_s10 }
   0x6   : > { %p67_p1 = scmp.eq.s32.totalorder %s66_s17, 0  ;;  %p80_p2 = scmp.eq.s32.totalorder %s4096_s13, 1 }
   0x7   : > { %p85_p3 = scmp.ne.s32.totalorder %s4047_s10, %s4043_s9  ;;  %p86_p4 = scmp.eq.s32.totalorder %s2966_s14, 1 }
   0x8   : > { %s4111_s18 = scalar_select %p67_p1, %s4051_s11, %s69_s16  }
   0x9   : > { %p4113_p5 = por %p80_p2, %p79_p0  ;;  %p4117_p6 = por %p86_p4, %p85_p3 }
   0xa   : > { %p2969_p7 = scmp.ge.s32.totalorder %s4055_s12, 1  ;;  %p115_p8 = scmp.lt.s32.totalorder %s4055_s12, 3 }
   0xc   : > { %p116_p9 = pnand %p2969_p7, %p115_p8 }
   0xe   : > { %119 = sbr.rel (%p116_p9) target bundleno = 572 (0x23c), region = 28 }
  0x15   : > { %v2972_v0 = vld [vmem:[%s5167_s1 + $0x2] sm:$0x3]  ;;  %vm684_vm0 = vcmask 1041408   ;;  %v3104_v1 = vld [vmem:[%s5167_s1 + $0x8] sm:$0x3]  ;;  %p137_p10 = scmp.lt.s32.totalorder %s4096_s13, 1 }
  0x16   : > { %3919 = vmatprep.subr.msk.bf16.mxu1 %vm684_vm0, %v2972_v0  ;;  %3923 = vmatprep.subr.msk.bf16.mxu0 %vm684_vm0, %v3104_v1  ;;  %v686_v2 = vsel %vm684_vm0, %v2972_v0, 0  ;;  %v4134_v3 = vsel %vm684_vm0, %v3104_v1, 0  ;;  %v197_v4 = vld [vmem:[%s5167_s1] sm:$0x3]  ;;  %v3123_v5 = vld [vmem:[%s5167_s1 + $0xa] sm:$0x3] }
  0x17   : > { %5202 = vst [vmem:[#allocation5_spill] sm:$0xff] %v4134_v3  ;;  %3356 = vmatpush3.bf16.msra.mxu1 %v686_v2  ;;  %3492 = vmatpush3.bf16.msra.mxu0 %v4134_v3  ;;  %s138_s25 = scalar_select %p137_p10, %s4096_s13, 1  ;;  %vm198_vm1 = vsmask.f32 3328  ;;  %vm199_vm2 = vsmask.f32 7440 }
  0x18   : > { %3920 = vmatprep.subr.msk.bf16.mxu1 %vm684_vm0, %v197_v4  ;;  %3925 = vmatprep.subr.msk.bf16.mxu0 %vm684_vm0, %v3123_v5  ;;  %v4152_v6 = vsel %vm684_vm0, %v197_v4, 0  ;;  %v4155_v7 = vsel %vm684_vm0, %v3123_v5, 0  ;;  %v4160_v8 = vld [vmem:[%s5167_s1 + $0xc] sm:$0x3]  ;;  %vm635_vm3 = vcmask 31744   ;;  %vm4196_vm4 = vmor %vm198_vm1, %vm199_vm2  ;;  %vm1157_vm5 = vcmask 1042432  }
  0x19   : > { %s3929_s30 = smul.u32 216, %s138_s25  ;;  %v4184_v20 = vsel %vm684_vm0, %v4160_v8, 0  ;;  %vm1158_vm6 = vcmask 1046532   ;;  %s134_s27 = sand.u32 1, %s4047_s10  }
  0x1a   : > { %vm4377_vm7 = vmor %vm1157_vm5, %vm1158_vm6  ;;  %s2970_s28 = sshll.u32 %s134_s27, 8  ;;  %s4057_s8 = smov [#allocation2]  }
  0x1b   : > { %s4149_s5 = scalar_lea.vmem %s5166_s0, %s3929_s30  ;;  %s5080_s29 = scalar_lea.vmem [#allocation2], %s2970_s28 }
  0x1c   : > { %v4163_v9 = vld [vmem:[%s4149_s5] sm:$0xf]  ;;  %v4166_v10 = vld [vmem:[%s4149_s5 + $0x4] sm:$0xf]  ;;  %v145_v11 = vld [vmem:[%s4149_s5 + $0x8] sm:$0x1] }
  0x1d   : > { %v202_v12 = vshrl.u32 %v4163_v9, 16  ;;  %v205_v13 = vshll.u32 %v4163_v9, 16  ;;  %v211_v14 = vshll.u32 %v4166_v10, 16  ;;  %v215_v15 = vshrl.u32 %v4166_v10, 16  ;;  %v4174_v16 = vld [vmem:[%s4149_s5 + $0xc] sm:$0xf] }
  0x1e   : > { %v221_v17 = vshll.u32 %v145_v11, 16  ;;  %v4177_v18 = vld [vmem:[%s4149_s5 + $0x10] sm:$0xf]  ;;  %v4180_v19 = vld [vmem:[%s4149_s5 + $0x14] sm:$0x1]  ;;  %v226_v26 = vshrl.u32 %v4174_v16, 16 }
  0x1f   : > { %v204_v21 = vrot.slane %v202_v12, 4  ;;  %v207_v22 = vrot.slane %v205_v13, 5  ;;  %v213_v23 = vrot.slane %v211_v14, 5  ;;  %v217_v24 = vrot.slane %v215_v15, 4  ;;  %v4192_v33 = vld [vmem:[%s4149_s5 + $0x18] sm:$0xf] }
  0x20   : > { %v223_v25 = vrot.slane %v221_v17, 5  ;;  %v229_v27 = vshll.u32 %v4174_v16, 16  ;;  %v235_v28 = vshll.u32 %v4177_v18, 16  ;;  %v239_v31 = vshrl.u32 %v4177_v18, 16  ;;  %v4205_v39 = vld [vmem:[%s4149_s5 + $0x1c] sm:$0xf] }
  0x21   : > { %v208_v29 = vor.u32 %v207_v22, %v204_v21  ;;  %v218_v30 = vor.u32 %v217_v24, %v213_v23  ;;  %v245_v32 = vshll.u32 %v4180_v19, 16  ;;  %v228_v35 = vrot.slane %v226_v26, 4  ;;  %v4209_v46 = vld [vmem:[%s4149_s5 + $0x20] sm:$0x1]  ;;  %v4219_v57 = vld [vmem:[%s4149_s5 + $0x24] sm:$0xf] }
  0x22   : > { %v231_v36 = vrot.slane %v229_v27, 5  ;;  %v237_v37 = vrot.slane %v235_v28, 5  ;;  %v4202_v38 = vcombine.low %v4174_v16, %v4177_v18  ;;  %v241_v42 = vrot.slane %v239_v31, 4  ;;  %v4224_v62 = vld [vmem:[%s4149_s5 + $0x28] sm:$0xf]  ;;  %s3201_s30 = sshll.u32 %s4096_s13, 12 }
  0x23   : > { %v209_v40 = vrot.slane %v208_v29, 4  ;;  %v219_v41 = vrot.slane %v218_v30, 4  ;;  %v247_v43 = vrot.slane %v245_v32, 5  ;;  %v1172_v45 = vrot.slane %v4180_v19, 5  ;;  %v4232_v4 = vld [vmem:[%s4149_s5 + $0x2c] sm:$0x1]  ;;  %s5116_s6 = scalar_lea.hbm %s5168_s2, %s3201_s30 }
  0x24   : > { %v232_v44 = vor.u32 %v231_v36, %v228_v35  ;;  %v250_v47 = vshrl.u32 %v4192_v33, 16  ;;  %v253_v48 = vshll.u32 %v4192_v33, 16  ;;  %v242_v51 = vor.u32 %v241_v42, %v237_v37  ;;  %v4238_v14 = vld [vmem:[%s4149_s5 + $0x30] sm:$0xf]  ;;  %v4250_v28 = vld [vmem:[%s4149_s5 + $0x34] sm:$0xf] }
  0x25   : > { %v214_v49 = vsel %vm4196_vm4, %v209_v40, %v213_v23  ;;  %v224_v50 = vsel %vm4196_vm4, %v219_v41, %v223_v25  ;;  %v259_v52 = vshll.u32 %v4205_v39, 16  ;;  %v263_v60 = vshrl.u32 %v4205_v39, 16  ;;  %v4245_v23 = vld [vmem:[%s5167_s1 + $0x4] sm:$0x3]  ;;  %v4257_v32 = vld [vmem:[%s4149_s5 + $0x38] sm:$0x1] }
  0x26   : > { %v2973_v53 = vcombine.low %v214_v49, %v224_v50  ;;  %v233_v54 = vrot.slane %v232_v44, 4  ;;  %v252_v55 = vrot.slane %v250_v47, 4  ;;  %v255_v56 = vrot.slane %v253_v48, 5  ;;  %v4265_v48 = vld [vmem:[%s4149_s5 + $0x3c] sm:$0xf]  ;;  %s2904_s3 = sshll.u32 %s5080_s29, 4  ;;  %s5118_s3 = int_to_ptr.vmem [resolvable:$true] %s2904_s3 }
  0x27   : > { %v243_v58 = vrot.slane %v242_v51, 4  ;;  %v261_v59 = vrot.slane %v259_v52, 5  ;;  %v269_v61 = vshll.u32 %v4209_v46, 16  ;;  %v1176_v1 = vrot.slane %v4205_v39, 5  ;;  %v4273_v52 = vld [vmem:[%s4149_s5 + $0x40] sm:$0xf] }
  0x28   : > { %3357 = vmatprep.mubr.msk.bf16.mxu1 %vm635_vm3, %v2973_v53  ;;  %v238_v63 = vsel %vm4196_vm4, %v233_v54, %v237_v37  ;;  %v256_v0 = vor.u32 %v255_v56, %v252_v55  ;;  %v1179_v2 = vrot.slane %v4209_v46, 5  ;;  %v265_v11 = vrot.slane %v263_v60, 4  ;;  %s5125_s13 = scalar_lea.sflag [#allocation3], %s134_s27  ;;  %s3993_s7 = scalar_lea.vmem %s5118_s3, 4096 }
  0x29   : > { %v248_v5 = vsel %vm4196_vm4, %v243_v58, %v247_v43  ;;  %v271_v12 = vrot.slane %v269_v61, 5  ;;  %v274_v13 = vshrl.u32 %v4219_v57, 16  ;;  %v277_v21 = vshll.u32 %v4219_v57, 16  ;;  %p3994_p11 = scmp.ne.s32.totalorder %s5118_s3, %s3993_s7  ;;  %s3997_s14 = sshll.u32 %s4057_s8, 4  ;;  %s3998_s14 = int_to_ptr.vmem [resolvable:$false] %s3997_s14 }
  0x2a   : > { %v2974_v15 = vcombine.low %v238_v63, %v248_v5  ;;  %v257_v17 = vrot.slane %v256_v0, 4  ;;  %v283_v22 = vshll.u32 %v4224_v62, 16  ;;  %v266_v24 = vor.u32 %v265_v11, %v261_v59  ;;  %v4285_v5 = vld [vmem:[%s4149_s5 + $0x44] sm:$0x1]  ;;  %s3999_s16 = scalar_lea.vmem %s3998_s14, 8192  ;;  %p4000_p0 = scmp.lt.s32.totalorder %s5118_s3, %s3998_s14 }
  0x2b   : > { %v276_v25 = vrot.slane %v274_v13, 4  ;;  %v287_v26 = vshrl.u32 %v4224_v62, 16  ;;  %v293_v27 = vshll.u32 %v4232_v4, 16  ;;  %v279_v30 = vrot.slane %v277_v21, 5  ;;  %v4290_v13 = vld [vmem:[%s4149_s5 + $0x48] sm:$0xf]  ;;  %p3995_p12 = pnand %p3994_p11, %p4113_p5  ;;  %p4001_p1 = scmp.lt.s32.totalorder %s3999_s16, %s3993_s7 }
  0x2c   : > { %3493 = vmatprep.mubr.msk.bf16.mxu0 %vm635_vm3, %v2974_v15  ;;  %3358 = vmatmul.mubr.msk.bf16.vlgmr.msra.gmra.mrb[0].mxu1 %vm635_vm3, %v2974_v15  ;;  %v262_v29 = vsel %vm4196_vm4, %v257_v17, %v261_v59  ;;  %v285_v31 = vrot.slane %v283_v22, 5  ;;  %v298_v35 = vshrl.u32 %v4238_v14, 16  ;;  %v267_v36 = vrot.slane %v266_v24, 4  ;;  %v4297_v24 = vld [vmem:[%s4149_s5 + $0x4c] sm:$0xf] }
  0x2d   : > { %3390 = vmatpush3.bf16.msra.mxu1 %v4152_v6  ;;  %v289_v37 = vrot.slane %v287_v26, 4  ;;  %v295_v40 = vrot.slane %v293_v27, 5  ;;  %v301_v41 = vshll.u32 %v4238_v14, 16  ;;  %v280_v42 = vor.u32 %v279_v30, %v276_v25  ;;  %p3996_p13 = pneg %p3995_p12  ;;  %p4002_p2 = por %p4001_p1, %p4000_p0 }
  0x2e   : > { %v300_v43 = vrot.slane %v298_v35, 4  ;;  %v307_v44 = vshll.u32 %v4250_v28, 16  ;;  %v311_v47 = vshrl.u32 %v4250_v28, 16  ;;  %3921 = vmatprep.subr.msk.bf16.mxu1 %vm684_vm0, %v4245_v23  ;;  %v272_v49 = vsel %vm4196_vm4, %v267_v36, %v271_v12 }
  0x2f   : > { %v290_v6 = vor.u32 %v289_v37, %v285_v31  ;;  %v303_v50 = vrot.slane %v301_v41, 5  ;;  %v317_v51 = vshll.u32 %v4257_v32, 16  ;;  %v4275_v53 = vcombine.low %v262_v29, %v272_v49  ;;  %p4003_p3 = pnand %p4002_p2, %p3996_p13 }
  0x30   : > { %v281_v54 = vrot.slane %v280_v42, 4  ;;  %v309_v55 = vrot.slane %v307_v44, 5  ;;  %v313_v56 = vrot.slane %v311_v47, 4  ;;  %v322_v61 = vshrl.u32 %v4265_v48, 16  ;;  %v4319_v42 = vld [vmem:[%s4149_s5 + $0x54] sm:$0xf] }
  0x31   : > { %5205 = vst [vmem:[#allocation6_spill] sm:$0xff] %v4275_v53  ;;  %v291_v58 = vrot.slane %v290_v6, 4  ;;  %v304_v59 = vor.u32 %v303_v50, %v300_v43  ;;  %v319_v60 = vrot.slane %v317_v51, 5  ;;  %3494 = vmatmul.mubr.msk.bf16.vlgmr.msra.gmra.mrb[0].mxu0 %vm635_vm3, %v4275_v53  ;;  %3361 = vmatprep.mubr.msk.bf16.mxu1 %vm635_vm3, %v4275_v53  ;;  %v325_v11 = vshll.u32 %v4265_v48, 16  ;;  %5207 = vst [vmem:[#allocation8_spill] sm:$0xff] %v4319_v42 }
  0x32   : > { %v286_v63 = vsel %vm4196_vm4, %v281_v54, %v285_v31  ;;  %v314_v0 = vor.u32 %v313_v56, %v309_v55  ;;  %v331_v12 = vshll.u32 %v4273_v52, 16  ;;  %3526 = vmatpush3.bf16.msra.mxu0 %v4155_v7  ;;  %v324_v21 = vrot.slane %v322_v61, 4  ;;  %v4324_v6 = vld [vmem:[%s4149_s5 + $0x58] sm:$0xf] }
  0x33   : > { %v296_v15 = vsel %vm4196_vm4, %v291_v58, %v295_v40  ;;  %v305_v17 = vrot.slane %v304_v59, 4  ;;  %v335_v22 = vshrl.u32 %v4273_v52, 16  ;;  %v327_v27 = vrot.slane %v325_v11, 5  ;;  %3926 = vmatprep.subr.msk.bf16.mxu0 %vm684_vm0, %v4160_v8  ;;  %v4314_v8 = vld [vmem:[%s4149_s5 + $0x50] sm:$0x1] }
  0x34   : > { %v4299_v25 = vcombine.low %v286_v63, %v296_v15  ;;  %v315_v26 = vrot.slane %v314_v0, 4  ;;  %v333_v29 = vrot.slane %v331_v12, 5  ;;  %v341_v31 = vshll.u32 %v4285_v5, 16  ;;  %v4337_v11 = vld [vmem:[%s4149_s5 + $0x5c] sm:$0x1] }
  0x35   : > { %v310_v7 = vsel %vm4196_vm4, %v305_v17, %v309_v55  ;;  %v337_v30 = vrot.slane %v335_v22, 4  ;;  %v346_v35 = vshrl.u32 %v4290_v13, 16  ;;  %v328_v37 = vor.u32 %v327_v27, %v324_v21  ;;  %v4341_v15 = vld [vmem:[%s4149_s5 + $0x60] sm:$0xf]  ;;  %v4346_v27 = vld [vmem:[%s4149_s5 + $0x64] sm:$0xf] }
  0x36   : > { %5206 = vst [vmem:[#allocation7_spill] sm:$0xff] %v4299_v25  ;;  %3497 = vmatprep.mubr.msk.bf16.mxu0 %vm635_vm3, %v4299_v25  ;;  %3362 = vmatmul.mubr.msk.bf16.gmra.mrb[4].mxu1 %vm635_vm3, %v4299_v25  ;;  %v320_v36 = vsel %vm4196_vm4, %v315_v26, %v319_v60  ;;  %v349_v40 = vshll.u32 %v4290_v13, 16  ;;  %v355_v41 = vshll.u32 %v4297_v24, 16  ;;  %v343_v47 = vrot.slane %v341_v31, 5  ;;  %v4558_v25 = vld [vmem:[%s4149_s5 + $0xa8] sm:$0xf] }
  0x37   : > { %v4321_v43 = vcombine.low %v310_v7, %v320_v36  ;;  %v338_v44 = vor.u32 %v337_v30, %v333_v29  ;;  %v348_v49 = vrot.slane %v346_v35, 4  ;;  %v329_v50 = vrot.slane %v328_v37, 4 }
  0x38   : > { %v351_v51 = vrot.slane %v349_v40, 5  ;;  %v357_v54 = vrot.slane %v355_v41, 5  ;;  %v359_v55 = vshrl.u32 %v4297_v24, 16  ;;  %v365_v58 = vshll.u32 %v4314_v8, 16 }
  0x39   : > { %5208 = vst [vmem:[#allocation9_spill] sm:$0xff] %v4321_v43  ;;  %3365 = vmatprep.mubr.msk.bf16.mxu1 %vm635_vm3, %v4321_v43  ;;  %v339_v56 = vrot.slane %v338_v44, 4  ;;  %v370_v59 = vshrl.u32 %v4319_v42, 16  ;;  %v373_v60 = vshll.u32 %v4319_v42, 16  ;;  %3498 = vmatmul.mubr.msk.bf16.gmra.mrb[4].mxu0 %vm635_vm3, %v4321_v43  ;;  %v334_v61 = vsel %vm4196_vm4, %v329_v50, %v333_v29 }
  0x3a   : > { %v352_v63 = vor.u32 %v351_v51, %v348_v49  ;;  %v361_v0 = vrot.slane %v359_v55, 4  ;;  %v379_v12 = vshll.u32 %v4324_v6, 16  ;;  %v367_v21 = vrot.slane %v365_v58, 5 }
  0x3b   : > { %v344_v17 = vsel %vm4196_vm4, %v339_v56, %v343_v47  ;;  %v372_v22 = vrot.slane %v370_v59, 4  ;;  %v375_v26 = vrot.slane %v373_v60, 5  ;;  %v383_v36 = vshrl.u32 %v4324_v6, 16  ;;  %v4360_v47 = vld [vmem:[%s4149_s5 + $0x68] sm:$0x1] }
  0x3c   : > { %v4348_v7 = vcombine.low %v334_v61, %v344_v17  ;;  %v353_v29 = vrot.slane %v352_v63, 4  ;;  %v362_v30 = vor.u32 %v361_v0, %v357_v54  ;;  %v381_v31 = vrot.slane %v379_v12, 5 }
  0x3d   : > { %v376_v35 = vor.u32 %v375_v26, %v372_v22  ;;  %v389_v37 = vshll.u32 %v4337_v11, 16  ;;  %v394_v40 = vshrl.u32 %v4341_v15, 16  ;;  %v397_v49 = vshll.u32 %v4341_v15, 16 }
  0x3e   : > { %5209 = vst [vmem:[#allocation10_spill] sm:$0xff] %v4348_v7  ;;  %3501 = vmatprep.mubr.msk.bf16.mxu0 %vm635_vm3, %v4348_v7  ;;  %3366 = vmatmul.mubr.msk.bf16.gmra.mrb[8].mxu1 %vm635_vm3, %v4348_v7  ;;  %v358_v41 = vsel %vm4196_vm4, %v353_v29, %v357_v54  ;;  %v363_v44 = vrot.slane %v362_v30, 4  ;;  %v403_v50 = vshll.u32 %v4346_v27, 16  ;;  %v385_v55 = vrot.slane %v383_v36, 4  ;;  %v4368_v54 = vld [vmem:[%s4149_s5 + $0x6c] sm:$0xf] }
  0x3f   : > { %v377_v51 = vrot.slane %v376_v35, 4  ;;  %v391_v56 = vrot.slane %v389_v37, 5  ;;  %v396_v58 = vrot.slane %v394_v40, 4  ;;  %v399_v60 = vrot.slane %v397_v49, 5  ;;  %v4384_v36 = vld [vmem:[%s4149_s5 + $0x70] sm:$0xf] }
  0x40   : > { %v368_v59 = vsel %vm4196_vm4, %v363_v44, %v367_v21  ;;  %v405_v61 = vrot.slane %v403_v50, 5  ;;  %v407_v63 = vshrl.u32 %v4346_v27, 16  ;;  %v386_v17 = vor.u32 %v385_v55, %v381_v31  ;;  %v4535_v7 = vld [vmem:[%s4149_s5 + $0xa0] sm:$0xf] }
  0x41   : > { %v4370_v0 = vcombine.low %v358_v41, %v368_v59  ;;  %v382_v12 = vsel %vm4196_vm4, %v377_v51, %v381_v31  ;;  %v413_v22 = vshll.u32 %v4360_v47, 16  ;;  %v400_v21 = vor.u32 %v399_v60, %v396_v58  ;;  %v4397_v51 = vld [vmem:[%s4149_s5 + $0x74] sm:$0x1] }
  0x42   : > { %v409_v29 = vrot.slane %v407_v63, 4  ;;  %v3038_v30 = vrot.slane %v4174_v16, 9  ;;  %v1169_v35 = vrot.slane %v4177_v18, 5  ;;  %v387_v31 = vrot.slane %v386_v17, 4 }
  0x43   : > { %5210 = vst [vmem:[#allocation11_spill] sm:$0xff] %v4370_v0  ;;  %3502 = vmatmul.mubr.msk.bf16.gmra.mrb[8].mxu0 %vm635_vm3, %v4370_v0  ;;  %3369 = vmatprep.mubr.msk.bf16.mxu1 %vm635_vm3, %v4370_v0  ;;  %v415_v37 = vrot.slane %v413_v22, 5  ;;  %v418_v40 = vshrl.u32 %v4368_v54, 16  ;;  %v421_v41 = vshll.u32 %v4368_v54, 16  ;;  %v401_v44 = vrot.slane %v400_v21, 4 }
  0x44   : > { %v410_v49 = vor.u32 %v409_v29, %v405_v61  ;;  %v1170_v16 = vsel %vm4377_vm7, %v3038_v30, %v1169_v35  ;;  %v1171_v18 = vrot.slane %v1169_v35, 4  ;;  %v392_v50 = vsel %vm4196_vm4, %v387_v31, %v391_v56  ;;  %v4409_v56 = vld [vmem:[%s4149_s5 + $0x78] sm:$0xf]  ;;  %v4425_v31 = vld [vmem:[%s4149_s5 + $0x7c] sm:$0xf] }
  0x45   : > { %v420_v55 = vrot.slane %v418_v40, 4  ;;  %v423_v58 = vrot.slane %v421_v41, 5  ;;  %v427_v59 = vshll.u32 %v4384_v36, 16  ;;  %v4400_v60 = vcombine.low %v382_v12, %v392_v50 }
  0x46   : > { %v406_v63 = vsel %vm4196_vm4, %v401_v44, %v405_v61  ;;  %v411_v17 = vrot.slane %v410_v49, 4  ;;  %v1173_v22 = vsel %vm4377_vm7, %v1171_v18, %v1172_v45  ;;  %v431_v35 = vshrl.u32 %v4384_v36, 16  ;;  %v4430_v49 = vld [vmem:[%s4149_s5 + $0x80] sm:$0x1] }
  0x47   : > { %5213 = vst [vmem:[#allocation12_spill] sm:$0xff] %v4400_v60  ;;  %v4411_v21 = vcombine.low %v1170_v16, %v1173_v22  ;;  %v424_v29 = vor.u32 %v423_v58, %v420_v55  ;;  %v429_v30 = vrot.slane %v427_v59, 5  ;;  %3505 = vmatprep.mubr.msk.bf16.mxu0 %vm635_vm3, %v4400_v60  ;;  %3370 = vmatmul.mubr.msk.bf16.gmra.mrb[12].mxu1 %vm635_vm3, %v4400_v60  ;;  %v437_v45 = vshll.u32 %v4397_v51, 16  ;;  %v4528_v60 = vld [vmem:[%s4149_s5 + $0x9c] sm:$0xf] }
  0x48   : > { %v416_v19 = vsel %vm4196_vm4, %v411_v17, %v415_v37  ;;  %v3039_v61 = vrot.slane %v4192_v33, 9  ;;  %v1178_v12 = vrot.slane %v1176_v1, 4  ;;  %v433_v44 = vrot.slane %v431_v35, 4 }
  0x49   : > { %5214 = vst [vmem:[#allocation13_spill] sm:$0xff] %v4411_v21  ;;  %v4427_v40 = vcombine.low %v406_v63, %v416_v19  ;;  %v425_v41 = vrot.slane %v424_v29, 4  ;;  %v442_v16 = vshrl.u32 %v4409_v56, 16  ;;  %v439_v18 = vrot.slane %v437_v45, 5  ;;  %v4456_v29 = vld [vmem:[%s4149_s5 + $0x84] sm:$0xf] }
  0x4a   : > { %v1177_v37 = vsel %vm4377_vm7, %v3039_v61, %v1176_v1  ;;  %v1180_v50 = vsel %vm4377_vm7, %v1178_v12, %v1179_v2  ;;  %v445_v55 = vshll.u32 %v4409_v56, 16  ;;  %v434_v59 = vor.u32 %v433_v44, %v429_v30 }
  0x4b   : > { %5215 = vst [vmem:[#allocation14_spill] sm:$0xff] %v4427_v40  ;;  %3506 = vmatmul.mubr.msk.bf16.gmra.mrb[12].mxu0 %vm635_vm3, %v4427_v40  ;;  %3373 = vmatprep.mubr.msk.bf16.mxu1 %vm635_vm3, %v4427_v40  ;;  %v430_v58 = vsel %vm4196_vm4, %v425_v41, %v429_v30  ;;  %v4448_v63 = vcombine.low %v1177_v37, %v1180_v50  ;;  %v444_v1 = vrot.slane %v442_v16, 4  ;;  %v451_v2 = vshll.u32 %v4425_v31, 16  ;;  %v4462_v16 = vld [vmem:[%s4149_s5 + $0x88] sm:$0xf] }
  0x4c   : > { %3527 = vmatprep.mubr.msk.bf16.mxu0 %vm635_vm3, %v4411_v21  ;;  %v447_v46 = vrot.slane %v445_v55, 5  ;;  %v455_v17 = vshrl.u32 %v4425_v31, 16  ;;  %v461_v22 = vshll.u32 %v4430_v49, 16  ;;  %v435_v35 = vrot.slane %v434_v59, 4 }
  0x4d   : > { %5216 = vst [vmem:[#allocation15_spill] sm:$0xff] %v4448_v63  ;;  %v3040_v30 = vrot.slane %v4219_v57, 9  ;;  %v1183_v19 = vrot.slane %v4224_v62, 5  ;;  %v1186_v45 = vrot.slane %v4232_v4, 5  ;;  %v453_v12 = vrot.slane %v451_v2, 5 }
  0x4e   : > { %v448_v61 = vor.u32 %v447_v46, %v444_v1  ;;  %v457_v41 = vrot.slane %v455_v17, 4  ;;  %v463_v44 = vrot.slane %v461_v22, 5  ;;  %v440_v37 = vsel %vm4196_vm4, %v435_v35, %v439_v18  ;;  %v4472_v1 = vld [vmem:[%s4149_s5 + $0x8c] sm:$0x1] }
  0x4f   : > { %v1184_v50 = vsel %vm4377_vm7, %v3040_v30, %v1183_v19  ;;  %v1185_v55 = vrot.slane %v1183_v19, 4  ;;  %v466_v59 = vshrl.u32 %v4456_v29, 16  ;;  %v4469_v3 = vcombine.low %v430_v58, %v440_v37 }
  0x50   : > { %v449_v40 = vrot.slane %v448_v61, 4  ;;  %v458_v4 = vor.u32 %v457_v41, %v453_v12  ;;  %v469_v46 = vshll.u32 %v4456_v29, 16  ;;  %v475_v18 = vshll.u32 %v4462_v16, 16  ;;  %v4486_v61 = vld [vmem:[%s4149_s5 + $0x90] sm:$0xf] }
  0x51   : > { %5217 = vst [vmem:[#allocation16_spill] sm:$0xff] %v4469_v3  ;;  %v1187_v2 = vsel %vm4377_vm7, %v1185_v55, %v1186_v45  ;;  %v468_v17 = vrot.slane %v466_v59, 4  ;;  %v479_v22 = vshrl.u32 %v4462_v16, 16  ;;  %3374 = vmatmul.mubr.msk.bf16.gmra.mrb[16].mxu1 %vm635_vm3, %v4469_v3  ;;  %v4491_v45 = vld [vmem:[%s5167_s1 + $0xe] sm:$0x3]  ;;  %v1190_v59 = vrot.slane %v4250_v28, 5 }
  0x52   : > { %v454_v58 = vsel %vm4196_vm4, %v449_v40, %v453_v12  ;;  %v459_v35 = vrot.slane %v458_v4, 4  ;;  %v4483_v30 = vcombine.low %v1184_v50, %v1187_v2  ;;  %v471_v19 = vrot.slane %v469_v46, 5  ;;  %5219 = vst [vmem:[#allocation18_spill] sm:$0xff] %v4491_v45  ;;  %v4505_v46 = vld [vmem:[%s4149_s5 + $0x94] sm:$0xf] }
  0x53   : > { %3528 = vmatmul.mubr.msk.bf16.vlgmr.msra.gmra.mrb[0].mxu0 %vm635_vm3, %v4448_v63  ;;  %v477_v41 = vrot.slane %v475_v18, 5  ;;  %v481_v37 = vrot.slane %v479_v22, 4  ;;  %v485_v40 = vshll.u32 %v4472_v1, 16  ;;  %v3041_v12 = vrot.slane %v4238_v14, 9  ;;  %v4510_v3 = vld [vmem:[%s4149_s5 + $0x98] sm:$0x1] }
  0x54   : > { %5218 = vst [vmem:[#allocation17_spill] sm:$0xff] %v4483_v30  ;;  %3560 = vmatpush3.bf16.msra.mxu0 %v4184_v20  ;;  %v464_v50 = vsel %vm4196_vm4, %v459_v35, %v463_v44  ;;  %3531 = vmatprep.mubr.msk.bf16.mxu0 %vm635_vm3, %v4483_v30  ;;  %v472_v55 = vor.u32 %v471_v19, %v468_v17  ;;  %v1193_v4 = vrot.slane %v4257_v32, 5  ;;  %v490_v20 = vshrl.u32 %v4486_v61, 16 }
  0x55   : > { %v4507_v2 = vcombine.low %v454_v58, %v464_v50  ;;  %v482_v18 = vor.u32 %v481_v37, %v477_v41  ;;  %v487_v22 = vrot.slane %v485_v40, 5  ;;  %3927 = vmatprep.subr.msk.bf16.mxu0 %vm684_vm0, %v4491_v45  ;;  %v1191_v17 = vsel %vm4377_vm7, %v3041_v12, %v1190_v59 }
  0x56   : > { %v473_v44 = vrot.slane %v472_v55, 4  ;;  %v1192_v35 = vrot.slane %v1190_v59, 4  ;;  %v493_v32 = vshll.u32 %v4486_v61, 16  ;;  %v492_v19 = vrot.slane %v490_v20, 4 }
  0x57   : > { %5220 = vst [vmem:[#allocation19_spill] sm:$0xff] %v4507_v2  ;;  %3377 = vmatprep.mubr.msk.bf16.mxu1 %vm635_vm3, %v4507_v2  ;;  %v483_v58 = vrot.slane %v482_v18, 4  ;;  %v499_v37 = vshll.u32 %v4505_v46, 16  ;;  %v503_v40 = vshrl.u32 %v4505_v46, 16  ;;  %v509_v59 = vshll.u32 %v4510_v3, 16 }
  0x58   : > { %v478_v50 = vsel %vm4196_vm4, %v473_v44, %v477_v41  ;;  %v1194_v55 = vsel %vm4377_vm7, %v1192_v35, %v1193_v4  ;;  %v495_v12 = vrot.slane %v493_v32, 5  ;;  %v3042_v4 = vrot.slane %v4265_v48, 9 }
  0x59   : > { %v488_v2 = vsel %vm4196_vm4, %v483_v58, %v487_v22  ;;  %v4532_v18 = vcombine.low %v1191_v17, %v1194_v55  ;;  %v501_v20 = vrot.slane %v499_v37, 5  ;;  %v505_v0 = vrot.slane %v503_v40, 4  ;;  %v4548_v58 = vld [vmem:[%s4149_s5 + $0xa4] sm:$0x1] }
  0x5a   : > { %v4537_v43 = vcombine.low %v478_v50, %v488_v2  ;;  %v496_v41 = vor.u32 %v495_v12, %v492_v19  ;;  %v511_v44 = vrot.slane %v509_v59, 5  ;;  %v1197_v32 = vrot.slane %v4273_v52, 5 }
  0x5b   : > { %5221 = vst [vmem:[#allocation20_spill] sm:$0xff] %v4532_v18  ;;  %3532 = vmatmul.mubr.msk.bf16.gmra.mrb[4].mxu0 %vm635_vm3, %v4532_v18  ;;  %v506_v35 = vor.u32 %v505_v0, %v501_v20  ;;  %v1200_v22 = vrot.slane %v4285_v5, 5  ;;  %v514_v17 = vshrl.u32 %v4528_v60, 16  ;;  %v517_v19 = vshll.u32 %v4528_v60, 16 }
  0x5c   : > { %5222 = vst [vmem:[#allocation21_spill] sm:$0xff] %v4537_v43  ;;  %3378 = vmatmul.mubr.msk.bf16.gmra.mrb[20].mxu1 %vm635_vm3, %v4537_v43  ;;  %v497_v2 = vrot.slane %v496_v41, 4  ;;  %v523_v37 = vshll.u32 %v4535_v7, 16  ;;  %v527_v0 = vshrl.u32 %v4535_v7, 16  ;;  %v1198_v5 = vsel %vm4377_vm7, %v3042_v4, %v1197_v32 }
  0x5d   : > { %v507_v40 = vrot.slane %v506_v35, 4  ;;  %v1199_v50 = vrot.slane %v1197_v32, 4  ;;  %v516_v55 = vrot.slane %v514_v17, 4  ;;  %v519_v59 = vrot.slane %v517_v19, 5  ;;  %v4567_v32 = vld [vmem:[%s4149_s5 + $0xac] sm:$0xf] }
  0x5e   : > { %v502_v12 = vsel %vm4196_vm4, %v497_v2, %v501_v20  ;;  %v525_v41 = vrot.slane %v523_v37, 5  ;;  %v529_v43 = vrot.slane %v527_v0, 4  ;;  %v533_v35 = vshll.u32 %v4548_v58, 16 }
  0x5f   : > { %v512_v53 = vsel %vm4196_vm4, %v507_v40, %v511_v44  ;;  %v1201_v18 = vsel %vm4377_vm7, %v1199_v50, %v1200_v22  ;;  %v3043_v4 = vrot.slane %v4290_v13, 9  ;;  %v520_v2 = vor.u32 %v519_v59, %v516_v55 }
  0x60   : > { %v4569_v17 = vcombine.low %v502_v12, %v512_v53  ;;  %v4571_v20 = vcombine.low %v1198_v5, %v1201_v18  ;;  %v530_v19 = vor.u32 %v529_v43, %v525_v41  ;;  %v535_v37 = vrot.slane %v533_v35, 5  ;;  %v4581_v18 = vld [vmem:[%s4149_s5 + $0xb0] sm:$0x1] }
  0x61   : > { %v1204_v0 = vrot.slane %v4297_v24, 5  ;;  %v1207_v44 = vrot.slane %v4314_v8, 5  ;;  %v538_v22 = vshrl.u32 %v4558_v25, 16  ;;  %v521_v53 = vrot.slane %v520_v2, 4 }
  0x62   : > { %5223 = vst [vmem:[#allocation22_spill] sm:$0xff] %v4569_v17  ;;  %5224 = vst [vmem:[#allocation23_spill] sm:$0xff] %v4571_v20  ;;  %3381 = vmatprep.mubr.msk.bf16.mxu1 %vm635_vm3, %v4569_v17  ;;  %3535 = vmatprep.mubr.msk.bf16.mxu0 %vm635_vm3, %v4571_v20  ;;  %v531_v40 = vrot.slane %v530_v19, 4  ;;  %v541_v43 = vshll.u32 %v4558_v25, 16  ;;  %v547_v5 = vshll.u32 %v4567_v32, 16  ;;  %v551_v12 = vshrl.u32 %v4567_v32, 16 }
  0x63   : > { %v1205_v8 = vsel %vm4377_vm7, %v3043_v4, %v1204_v0  ;;  %v1206_v50 = vrot.slane %v1204_v0, 4  ;;  %v540_v55 = vrot.slane %v538_v22, 4  ;;  %v526_v59 = vsel %vm4196_vm4, %v521_v53, %v525_v41  ;;  %v4593_v17 = vld [vmem:[%s4149_s5 + $0xb4] sm:$0xf]  ;;  %v4605_v53 = vld [vmem:[%s4149_s5 + $0xb8] sm:$0xf] }
  0x64   : > { %v536_v35 = vsel %vm4196_vm4, %v531_v40, %v535_v37  ;;  %v543_v2 = vrot.slane %v541_v43, 5  ;;  %v549_v19 = vrot.slane %v547_v5, 5  ;;  %v553_v0 = vrot.slane %v551_v12, 4 }
  0x65   : > { %v4595_v20 = vcombine.low %v526_v59, %v536_v35  ;;  %v1208_v4 = vsel %vm4377_vm7, %v1206_v50, %v1207_v44  ;;  %v557_v22 = vshll.u32 %v4581_v18, 16  ;;  %v3044_v41 = vrot.slane %v4319_v42, 9  ;;  %v4611_v44 = vld [vmem:[%s4149_s5 + $0xbc] sm:$0x1] }
  0x66   : > { %v4600_v30 = vcombine.low %v1205_v8, %v1208_v4  ;;  %v544_v63 = vor.u32 %v543_v2, %v540_v55  ;;  %v1211_v37 = vrot.slane %v4324_v6, 5  ;;  %v554_v40 = vor.u32 %v553_v0, %v549_v19 }
  0x67   : > { %5225 = vst [vmem:[#allocation24_spill] sm:$0xff] %v4595_v20  ;;  %3382 = vmatmul.mubr.msk.bf16.gmra.mrb[24].mxu1 %vm635_vm3, %v4595_v20  ;;  %v559_v43 = vrot.slane %v557_v22, 5  ;;  %v1214_v5 = vrot.slane %v4337_v11, 5  ;;  %v562_v50 = vshrl.u32 %v4593_v17, 16  ;;  %v565_v59 = vshll.u32 %v4593_v17, 16 }
  0x68   : > { %5226 = vst [vmem:[#allocation25_spill] sm:$0xff] %v4600_v30  ;;  %3536 = vmatmul.mubr.msk.bf16.gmra.mrb[8].mxu0 %vm635_vm3, %v4600_v30  ;;  %v545_v8 = vrot.slane %v544_v63, 4  ;;  %v1212_v55 = vsel %vm4377_vm7, %v3044_v41, %v1211_v37  ;;  %v1213_v12 = vrot.slane %v1211_v37, 4  ;;  %v555_v35 = vrot.slane %v554_v40, 4 }
  0x69   : > { %v564_v2 = vrot.slane %v562_v50, 4  ;;  %v571_v4 = vshll.u32 %v4605_v53, 16  ;;  %v575_v11 = vshrl.u32 %v4605_v53, 16  ;;  %v567_v20 = vrot.slane %v565_v59, 5 }
  0x6a   : > { %v550_v0 = vsel %vm4196_vm4, %v545_v8, %v549_v19  ;;  %v1215_v22 = vsel %vm4377_vm7, %v1213_v12, %v1214_v5  ;;  %v581_v63 = vshll.u32 %v4611_v44, 16  ;;  %v560_v41 = vsel %vm4196_vm4, %v555_v35, %v559_v43 }
  0x6b   : > { %v4628_v37 = vcombine.low %v1212_v55, %v1215_v22  ;;  %v573_v40 = vrot.slane %v571_v4, 5  ;;  %v577_v50 = vrot.slane %v575_v11, 4  ;;  %v4630_v30 = vcombine.low %v550_v0, %v560_v41 }
  0x6c   : > { %v568_v21 = vor.u32 %v567_v20, %v564_v2  ;;  %v583_v45 = vrot.slane %v581_v63, 5  ;;  %v3045_v42 = vrot.slane %v4341_v15, 9  ;;  %v1218_v5 = vrot.slane %v4346_v27, 5 }
  0x6d   : > { %3539 = vmatprep.mubr.msk.bf16.mxu0 %vm635_vm3, %v4628_v37  ;;  %v578_v19 = vor.u32 %v577_v50, %v573_v40  ;;  %v1221_v8 = vrot.slane %v4360_v47, 5  ;;  %v3046_v43 = vrot.slane %v4368_v54, 9  ;;  %3385 = vmatprep.mubr.msk.bf16.mxu1 %vm635_vm3, %v4630_v30  ;;  %v3005_v20 = vcombine.low %v4163_v9, %v4166_v10 }
  0x6e   : > { %v569_v55 = vrot.slane %v568_v21, 4  ;;  %v1225_v12 = vrot.slane %v4384_v36, 5  ;;  %v1228_v59 = vrot.slane %v4397_v51, 5  ;;  %v1219_v2 = vsel %vm4377_vm7, %v3045_v42, %v1218_v5 }
  0x6f   : > { %v579_v35 = vrot.slane %v578_v19, 4  ;;  %v1220_v4 = vrot.slane %v1218_v5, 4  ;;  %v1232_v47 = vrot.slane %v4425_v31, 5  ;;  %v3047_v9 = vrot.slane %v4409_v56, 9 }
  0x70   : > { %v574_v11 = vsel %vm4196_vm4, %v569_v55, %v573_v40  ;;  %v1226_v21 = vsel %vm4377_vm7, %v3046_v43, %v1225_v12  ;;  %v1227_v0 = vrot.slane %v1225_v12, 4  ;;  %v1235_v42 = vrot.slane %v4430_v49, 5 }
  0x71   : > { %v584_v10 = vsel %vm4196_vm4, %v579_v35, %v583_v45  ;;  %v1222_v51 = vsel %vm4377_vm7, %v1220_v4, %v1221_v8  ;;  %v1234_v22 = vrot.slane %v1232_v47, 4  ;;  %v3048_v19 = vrot.slane %v4456_v29, 9 }
  0x72   : > { %v4657_v63 = vcombine.low %v574_v11, %v584_v10  ;;  %v4659_v41 = vcombine.low %v1219_v2, %v1222_v51  ;;  %v1229_v40 = vsel %vm4377_vm7, %v1227_v0, %v1228_v59  ;;  %v1239_v5 = vrot.slane %v4462_v16, 5 }
  0x73   : > { %v4663_v50 = vcombine.low %v1226_v21, %v1229_v40  ;;  %v1242_v49 = vrot.slane %v4472_v1, 5  ;;  %v1233_v45 = vsel %vm4377_vm7, %v3047_v9, %v1232_v47  ;;  %v1236_v8 = vsel %vm4377_vm7, %v1234_v22, %v1235_v42 }
  0x74   : > { %3386 = vmatmul.mubr.msk.bf16.gmra.mrb[28].mxu1 %vm635_vm3, %v4657_v63  ;;  %3540 = vmatmul.mubr.msk.bf16.gmra.mrb[12].mxu0 %vm635_vm3, %v4659_v41  ;;  %v1241_v43 = vrot.slane %v1239_v5, 4  ;;  %v1246_v55 = vrot.slane %v4505_v46, 5  ;;  %v1253_v12 = vrot.slane %v4535_v7, 5  ;;  %v1240_v59 = vsel %vm4377_vm7, %v3048_v19, %v1239_v5 }
  0x75   : > { %3391 = vmatprep.mubr.msk.bf16.mxu1 %vm635_vm3, %v3005_v20  ;;  %3543 = vmatprep.mubr.msk.bf16.mxu0 %vm635_vm3, %v4663_v50  ;;  %v4685_v20 = vcombine.low %v1233_v45, %v1236_v8  ;;  %v3049_v35 = vrot.slane %v4486_v61, 9  ;;  %v1249_v4 = vrot.slane %v4510_v3, 5  ;;  %v4691_v47 = vcombine.low %v4192_v33, %v4205_v39  ;;  %v4703_v3 = vld [vmem:[%s5167_s1 + $0x6] sm:$0x3] }
  0x76   : > { %v1243_v1 = vsel %vm4377_vm7, %v1241_v43, %v1242_v49  ;;  %v1248_v2 = vrot.slane %v1246_v55, 4  ;;  %v3050_v11 = vrot.slane %v4528_v60, 9  ;;  %v1371_v21 = vsel %vm684_vm0, %v4245_v23, 0 }
  0x77   : > { %v4696_v0 = vcombine.low %v1240_v59, %v1243_v1  ;;  %v1255_v9 = vrot.slane %v1253_v12, 4  ;;  %v1256_v10 = vrot.slane %v4548_v58, 5  ;;  %v1260_v51 = vrot.slane %v4567_v32, 5 }
  0x78   : > { %v1247_v33 = vsel %vm4377_vm7, %v3049_v35, %v1246_v55  ;;  %v1250_v39 = vsel %vm4377_vm7, %v1248_v2, %v1249_v4  ;;  %v4717_v23 = vcombine.low %v4219_v57, %v4224_v62  ;;  %v1254_v58 = vsel %vm4377_vm7, %v3050_v11, %v1253_v12 }
  0x79   : > { %v4723_v22 = vcombine.low %v4341_v15, %v4346_v27  ;;  %v1257_v42 = vsel %vm4377_vm7, %v1255_v9, %v1256_v10  ;;  %v3051_v40 = vrot.slane %v4558_v25, 9  ;;  %v1267_v19 = vrot.slane %v4605_v53, 5 }
  0x7a   : > { %v4733_v57 = vcombine.low %v4368_v54, %v4384_v36  ;;  %v4737_v62 = vcombine.low %v1247_v33, %v1250_v39  ;;  %v1262_v15 = vrot.slane %v1260_v51, 4  ;;  %v1263_v27 = vrot.slane %v4581_v18, 5  ;;  %v193_v18 = vld [vmem:[%s4149_s5 + $0xc8] sm:$0x1] }
  0x7b   : > { %v4742_v5 = vcombine.low %v4409_v56, %v4425_v31  ;;  %v4746_v49 = vcombine.low %v4456_v29, %v4462_v16  ;;  %v4750_v54 = vcombine.low %v4486_v61, %v4505_v46  ;;  %v4754_v36 = vcombine.low %v4528_v60, %v4535_v7  ;;  %v4773_v61 = vld [vmem:[%s4149_s5 + $0xc4] sm:$0xf] }
  0x7c   : > { %3392 = vmatmul.mubr.msk.bf16.vlgmr.msra.gmra.mrb[0].mxu1 %vm635_vm3, %v4202_v38  ;;  %3544 = vmatmul.mubr.msk.bf16.gmra.mrb[16].mxu0 %vm635_vm3, %v4685_v20  ;;  %v4758_v45 = vcombine.low %v4558_v25, %v4567_v32  ;;  %v4762_v56 = vcombine.low %v4238_v14, %v4250_v28  ;;  %v4764_v31 = vcombine.low %v1254_v58, %v1257_v42  ;;  %v3052_v16 = vrot.slane %v4593_v17, 9  ;;  %v5227_v42 = vld [vmem:[#allocation8_spill] sm:$0xff] }
  0x7d   : > { %3424 = vmatpush3.bf16.msra.mxu1 %v1371_v21  ;;  %3395 = vmatprep.mubr.msk.bf16.mxu1 %vm635_vm3, %v4691_v47  ;;  %v4768_v29 = vcombine.low %v4593_v17, %v4605_v53  ;;  %v1269_v7 = vrot.slane %v1267_v19, 4  ;;  %v1270_v60 = vrot.slane %v4611_v44, 5  ;;  %v1261_v14 = vsel %vm4377_vm7, %v3051_v40, %v1260_v51  ;;  %v4793_v17 = vld [vmem:[%s4149_s5 + $0xc0] sm:$0xf] }
  0x7e   : > { %3547 = vmatprep.mubr.msk.bf16.mxu0 %vm635_vm3, %v4696_v0  ;;  %3922 = vmatprep.subr.msk.bf16.mxu1 %vm684_vm0, %v4703_v3  ;;  %v1264_v28 = vsel %vm4377_vm7, %v1262_v15, %v1263_v27  ;;  %v2003_v25 = vrot.slane %v4773_v61, 5  ;;  %v1268_v46 = vsel %vm4377_vm7, %v3052_v16, %v1267_v19  ;;  %v4798_v53 = vcombine.low %v4265_v48, %v4273_v52 }
  0x7f   : > { %v1271_v32 = vsel %vm4377_vm7, %v1269_v7, %v1270_v60  ;;  %v4800_v44 = vcombine.low %v1261_v14, %v1264_v28  ;;  %v4804_v8 = vcombine.low %v4290_v13, %v4297_v24  ;;  %v1773_v43 = vshrl.u32 %v4793_v17, 16  ;;  %v3178_v60 = vld [vmem:[%s5167_s1 + $0x10] sm:$0x3]  ;;  %v3989_v14 = vld [vmem:[%s4149_s5 + $0x4] sm:$0xf] }
  0x80   : > { %v1776_v55 = vshll.u32 %v4793_v17, 16  ;;  %v1782_v12 = vshll.u32 %v4773_v61, 16  ;;  %v1786_v59 = vshrl.u32 %v4773_v61, 16  ;;  %v4810_v1 = vcombine.low %v1268_v46, %v1271_v32  ;;  %v3991_v32 = vld [vmem:[%s4149_s5] sm:$0xf] }
  0x81   : > { %v3122_v35 = vrot.slane %v4793_v17, 9  ;;  %v2005_v48 = vrot.slane %v2003_v25, 4  ;;  %v2006_v52 = vrot.slane %v193_v18, 5  ;;  %v1775_v2 = vrot.slane %v1773_v43, 4 }
  0x82   : > { %v1778_v4 = vrot.slane %v1776_v55, 5  ;;  %v1784_v11 = vrot.slane %v1782_v12, 5  ;;  %v1788_v21 = vrot.slane %v1786_v59, 4  ;;  %v1792_v9 = vshll.u32 %v193_v18, 16 }
  0x83   : > { %v2004_v10 = vsel %vm4377_vm7, %v3122_v35, %v2003_v25  ;;  %v2007_v51 = vsel %vm4377_vm7, %v2005_v48, %v2006_v52  ;;  %v4827_v40 = vcombine.low %v5227_v42, %v4324_v6  ;;  %v5228_v6 = vld [vmem:[#allocation18_spill] sm:$0xff]  ;;  %v1162_v28 = vrot.slane %v3989_v14, 5  ;;  %v5229_v48 = vld [vmem:[#allocation13_spill] sm:$0xff]  ;;  %v5230_v52 = vld [vmem:[#allocation15_spill] sm:$0xff] }
  0x84   : > { %3396 = vmatmul.mubr.msk.bf16.gmra.mrb[4].mxu1 %vm635_vm3, %v4717_v23  ;;  %3548 = vmatmul.mubr.msk.bf16.gmra.mrb[20].mxu0 %vm635_vm3, %v4737_v62  ;;  %v1779_v13 = vor.u32 %v1778_v4, %v1775_v2  ;;  %v1789_v24 = vor.u32 %v1788_v21, %v1784_v11  ;;  %v1794_v58 = vrot.slane %v1792_v9, 5  ;;  %v4829_v19 = vcombine.low %v2004_v10, %v2007_v51  ;;  %v3990_v25 = vld [vmem:[%s4149_s5 + $0x8] sm:$0x1]  ;;  %v5232_v4 = vld [vmem:[#allocation20_spill] sm:$0xff]  ;;  %v5233_v21 = vld [vmem:[#allocation23_spill] sm:$0xff] }
  0x85   : > { %3399 = vmatprep.mubr.msk.bf16.mxu1 %vm635_vm3, %v4762_v56  ;;  %3551 = vmatprep.mubr.msk.bf16.mxu0 %vm635_vm3, %v4764_v31  ;;  %v2451_v7 = vsel %vm684_vm0, %v5228_v6, 0  ;;  %v1165_v46 = vrot.slane %v3990_v25, 5  ;;  %v3037_v18 = vrot.slane %v3991_v32, 9  ;;  %v1164_v43 = vrot.slane %v1162_v28, 4  ;;  %v3992_v2 = vld [vmem:[%s5167_s1 + $0x8] sm:$0x3] }
  0x86   : > { %v1780_v33 = vrot.slane %v1779_v13, 4  ;;  %v1790_v39 = vrot.slane %v1789_v24, 4  ;;  %v1577_v35 = vsel %vm684_vm0, %v4703_v3, 0  ;;  %v5231_v3 = vld [vmem:[#allocation17_spill] sm:$0xff]  ;;  %v4924_v24 = vld [vmem:[%s4149_s5 + $0xcc] sm:$0xf] }
  0x87   : > { %v1163_v55 = vsel %vm4377_vm7, %v3037_v18, %v1162_v28  ;;  %v1166_v12 = vsel %vm4377_vm7, %v1164_v43, %v1165_v46  ;;  %v5234_v13 = vld [vmem:[#allocation25_spill] sm:$0xff]  ;;  %v4927_v9 = vld [vmem:[%s4149_s5 + $0xd0] sm:$0xf]  ;;  %v2663_v10 = vsel %vm684_vm0, %v3178_v60, 0  ;;  %v5240_v42 = vld [vmem:[#allocation12_spill] sm:$0xff]  ;;  %v2422_v14 = vshll.u32 %v4924_v24, 16 }
  0x88   : > { %v1785_v15 = vsel %vm4196_vm4, %v1780_v33, %v1784_v11  ;;  %v1795_v27 = vsel %vm4196_vm4, %v1790_v39, %v1794_v58  ;;  %v3054_v59 = vcombine.low %v1163_v55, %v1166_v12  ;;  %v4913_v11 = vcombine.low %v4793_v17, %v4773_v61  ;;  %v5235_v17 = vld [vmem:[#allocation6_spill] sm:$0xff]  ;;  %v5236_v51 = vld [vmem:[#allocation7_spill] sm:$0xff]  ;;  %v5237_v33 = vld [vmem:[#allocation9_spill] sm:$0xff] }
  0x89   : > { %v4835_v16 = vcombine.low %v1785_v15, %v1795_v27  ;;  %v3142_v61 = vcombine.low %v4924_v24, %v4927_v9  ;;  %v5238_v39 = vld [vmem:[#allocation10_spill] sm:$0xff]  ;;  %v5239_v58 = vld [vmem:[#allocation11_spill] sm:$0xff]  ;;  %v5242_v27 = vld [vmem:[#allocation16_spill] sm:$0xff]  ;;  %v2432_v28 = vshrl.u32 %v4927_v9, 16  ;;  %v2424_v32 = vrot.slane %v2422_v14, 5 }
  0x8a   : > { %v5241_v15 = vld [vmem:[#allocation14_spill] sm:$0xff]  ;;  %v5243_v6 = vld [vmem:[#allocation19_spill] sm:$0xff]  ;;  %v5245_v25 = vld [vmem:[#allocation5_spill] sm:$0xff]  ;;  %v2649_v34 = vrot.slane %v4927_v9, 5 }
  0x8b   : > { %v5246_v46 = vld [vmem:[#allocation22_spill] sm:$0xff]  ;;  %v2434_v43 = vrot.slane %v2432_v28, 4  ;;  %v196_v55 = vld [vmem:[%s4149_s5 + $0xd4] sm:$0x1]  ;;  %v5247_v12 = vld [vmem:[#allocation24_spill] sm:$0xff] }
  0x8c   : > { %3400 = vmatmul.mubr.msk.bf16.gmra.mrb[8].mxu1 %vm635_vm3, %v4798_v53  ;;  %3552 = vmatmul.mubr.msk.bf16.gmra.mrb[24].mxu0 %vm635_vm3, %v4800_v44 }
  0x8d   : > { %3403 = vmatprep.mubr.msk.bf16.mxu1 %vm635_vm3, %v4804_v8  ;;  %3555 = vmatprep.mubr.msk.bf16.mxu0 %vm635_vm3, %v4810_v1 }
  0x94   : > { %3404 = vmatmul.mubr.msk.bf16.gmra.mrb[12].mxu1 %vm635_vm3, %v4827_v40  ;;  %3556 = vmatmul.mubr.msk.bf16.gmra.mrb[28].mxu0 %vm635_vm3, %v4829_v19 }
  0x95   : > { %3407 = vmatprep.mubr.msk.bf16.mxu1 %vm635_vm3, %v4723_v22  ;;  %3561 = vmatprep.mubr.msk.bf16.mxu0 %vm635_vm3, %v4691_v47 }
  0x9c   : > { %3408 = vmatmul.mubr.msk.bf16.gmra.mrb[16].mxu1 %vm635_vm3, %v4733_v57  ;;  %3562 = vmatmul.mubr.msk.bf16.vlgmr.msra.gmra.mrb[0].mxu0 %vm635_vm3, %v4717_v23 }
  0x9d   : > { %3594 = vmatpush3.bf16.msra.mxu0 %v2451_v7  ;;  %3411 = vmatprep.mubr.msk.bf16.mxu1 %vm635_vm3, %v4742_v5  ;;  %v5244_v7 = vld [vmem:[#allocation21_spill] sm:$0xff] }
  0x9e   : > { %3565 = vmatprep.mubr.msk.bf16.mxu0 %vm635_vm3, %v4762_v56  ;;  %3928 = vmatprep.subr.msk.bf16.mxu0 %vm684_vm0, %v3178_v60  ;;  %v2419_v60 = vshrl.u32 %v4924_v24, 16 }
  0xa4   : > { %3412 = vmatmul.mubr.msk.bf16.gmra.mrb[20].mxu1 %vm635_vm3, %v4746_v49  ;;  %3566 = vmatmul.mubr.msk.bf16.gmra.mrb[4].mxu0 %vm635_vm3, %v4798_v53 }
  0xa5   : > { %3415 = vmatprep.mubr.msk.bf16.mxu1 %vm635_vm3, %v4750_v54  ;;  %3569 = vmatprep.mubr.msk.bf16.mxu0 %vm635_vm3, %v4804_v8 }
  0xac   : > { %3416 = vmatmul.mubr.msk.bf16.gmra.mrb[24].mxu1 %vm635_vm3, %v4754_v36  ;;  %3570 = vmatmul.mubr.msk.bf16.gmra.mrb[8].mxu0 %vm635_vm3, %v4827_v40 }
  0xad   : > { %3419 = vmatprep.mubr.msk.bf16.mxu1 %vm635_vm3, %v4758_v45  ;;  %3573 = vmatprep.mubr.msk.bf16.mxu0 %vm635_vm3, %v4723_v22 }
  0xb4   : > { %3420 = vmatmul.mubr.msk.bf16.gmra.mrb[28].mxu1 %vm635_vm3, %v4768_v29  ;;  %3574 = vmatmul.mubr.msk.bf16.gmra.mrb[12].mxu0 %vm635_vm3, %v4733_v57 }
  0xb5   : > { %3425 = vmatprep.mubr.msk.bf16.mxu1 %vm635_vm3, %v3054_v59  ;;  %3577 = vmatprep.mubr.msk.bf16.mxu0 %vm635_vm3, %v4742_v5 }
  0xbc   : > { %3426 = vmatmul.mubr.msk.bf16.vlgmr.msra.gmra.mrb[0].mxu1 %vm635_vm3, %v5229_v48  ;;  %3578 = vmatmul.mubr.msk.bf16.gmra.mrb[16].mxu0 %vm635_vm3, %v4746_v49 }
  0xbd   : > { %3458 = vmatpush3.bf16.msra.mxu1 %v1577_v35  ;;  %3429 = vmatprep.mubr.msk.bf16.mxu1 %vm635_vm3, %v5230_v52  ;;  %v2438_v35 = vshll.u32 %v196_v55, 16 }
  0xbe   : > { %3581 = vmatprep.mubr.msk.bf16.mxu0 %vm635_vm3, %v4750_v54  ;;  %3924 = vmatprep.subr.msk.bf16.mxu1 %vm684_vm0, %v3992_v2 }
  0xc4   : > { %3430 = vmatmul.mubr.msk.bf16.gmra.mrb[4].mxu1 %vm635_vm3, %v5231_v3  ;;  %3582 = vmatmul.mubr.msk.bf16.gmra.mrb[20].mxu0 %vm635_vm3, %v4754_v36 }
  0xc5   : > { %3433 = vmatprep.mubr.msk.bf16.mxu1 %vm635_vm3, %v5232_v4  ;;  %3585 = vmatprep.mubr.msk.bf16.mxu0 %vm635_vm3, %v4758_v45 }
  0xcc   : > { %3434 = vmatmul.mubr.msk.bf16.gmra.mrb[8].mxu1 %vm635_vm3, %v5233_v21  ;;  %3586 = vmatmul.mubr.msk.bf16.gmra.mrb[24].mxu0 %vm635_vm3, %v4768_v29 }
  0xcd   : > { %3437 = vmatprep.mubr.msk.bf16.mxu1 %vm635_vm3, %v5234_v13  ;;  %3589 = vmatprep.mubr.msk.bf16.mxu0 %vm635_vm3, %v4913_v11 }
  0xd4   : > { %3438 = vmatmul.mubr.msk.bf16.gmra.mrb[12].mxu1 %vm635_vm3, %v4628_v37  ;;  %3590 = vmatmul.mubr.msk.bf16.gmra.mrb[28].mxu0 %vm635_vm3, %v3142_v61  ;;  %v2440_v61 = vrot.slane %v2438_v35, 5 }
  0xd5   : > { %3441 = vmatprep.mubr.msk.bf16.mxu1 %vm635_vm3, %v4659_v41  ;;  %3595 = vmatprep.mubr.msk.bf16.mxu0 %vm635_vm3, %v5235_v17 }
  0xdc   : > { %3442 = vmatmul.mubr.msk.bf16.gmra.mrb[16].mxu1 %vm635_vm3, %v4663_v50  ;;  %3596 = vmatmul.mubr.msk.bf16.vlgmr.msra.gmra.mrb[0].mxu0 %vm635_vm3, %v5236_v51 }
  0xdd   : > { %3628 = vmatpush3.bf16.msra.mxu0 %v2663_v10  ;;  %3445 = vmatprep.mubr.msk.bf16.mxu1 %vm635_vm3, %v4685_v20 }
  0xde   : > { %3599 = vmatprep.mubr.msk.bf16.mxu0 %vm635_vm3, %v5237_v33 }
  0xe4   : > { %3446 = vmatmul.mubr.msk.bf16.gmra.mrb[20].mxu1 %vm635_vm3, %v4696_v0  ;;  %3600 = vmatmul.mubr.msk.bf16.gmra.mrb[4].mxu0 %vm635_vm3, %v5238_v39 }
  0xe5   : > { %3449 = vmatprep.mubr.msk.bf16.mxu1 %vm635_vm3, %v4737_v62  ;;  %3603 = vmatprep.mubr.msk.bf16.mxu0 %vm635_vm3, %v5239_v58 }
  0xec   : > { %3450 = vmatmul.mubr.msk.bf16.gmra.mrb[24].mxu1 %vm635_vm3, %v4764_v31  ;;  %3604 = vmatmul.mubr.msk.bf16.gmra.mrb[8].mxu0 %vm635_vm3, %v5240_v42 }
  0xed   : > { %3453 = vmatprep.mubr.msk.bf16.mxu1 %vm635_vm3, %v4800_v44  ;;  %3607 = vmatprep.mubr.msk.bf16.mxu0 %vm635_vm3, %v5241_v15 }
  0xf4   : > { %3454 = vmatmul.mubr.msk.bf16.gmra.mrb[28].mxu1 %vm635_vm3, %v4810_v1  ;;  %3608 = vmatmul.mubr.msk.bf16.gmra.mrb[12].mxu0 %vm635_vm3, %v5242_v27 }
  0xf5   : > { %3459 = vmatprep.mubr.msk.bf16.mxu1 %vm635_vm3, %v4202_v38  ;;  %3611 = vmatprep.mubr.msk.bf16.mxu0 %vm635_vm3, %v5243_v6  ;;  %v2428_v38 = vshll.u32 %v4927_v9, 16 }
  0xf7   : > { %v2430_v18 = vrot.slane %v2428_v38, 5 }
  0xf9   : > { %v2435_v59 = vor.u32 %v2434_v43, %v2430_v18 }
  0xfb   : > { %v2436_v2 = vrot.slane %v2435_v59, 4 }
  0xfc   : > { %3460 = vmatmul.mubr.msk.bf16.vlgmr.msra.gmra.mrb[0].mxu1 %vm635_vm3, %v4691_v47  ;;  %3612 = vmatmul.mubr.msk.bf16.gmra.mrb[16].mxu0 %vm635_vm3, %v5244_v7  ;;  %v2421_v47 = vrot.slane %v2419_v60, 4 }
  0xfd   : > { %3662 = vmatpush3.bf16.msra.mxu1 %v5245_v25  ;;  %3463 = vmatprep.mubr.msk.bf16.mxu1 %vm635_vm3, %v4717_v23 }
  0xfe   : > { %3615 = vmatprep.mubr.msk.bf16.mxu0 %vm635_vm3, %v5246_v46  ;;  %v2425_v23 = vor.u32 %v2424_v32, %v2421_v47 }
 0x100   : > { %v2426_v48 = vrot.slane %v2425_v23, 4 }
 0x104   : > { %3464 = vmatmul.mubr.msk.bf16.gmra.mrb[4].mxu1 %vm635_vm3, %v4762_v56  ;;  %3616 = vmatmul.mubr.msk.bf16.gmra.mrb[20].mxu0 %vm635_vm3, %v5247_v12  ;;  %v2431_v56 = vsel %vm4196_vm4, %v2426_v48, %v2430_v18 }
 0x105   : > { %3467 = vmatprep.mubr.msk.bf16.mxu1 %vm635_vm3, %v4798_v53  ;;  %3619 = vmatprep.mubr.msk.bf16.mxu0 %vm635_vm3, %v4630_v30  ;;  %v2441_v53 = vsel %vm4196_vm4, %v2436_v2, %v2440_v61 }
 0x106   : > { %v3160_v17 = vcombine.low %v2431_v56, %v2441_v53 }
 0x10c   : > { %3468 = vmatmul.mubr.msk.bf16.gmra.mrb[8].mxu1 %vm635_vm3, %v4804_v8  ;;  %3620 = vmatmul.mubr.msk.bf16.gmra.mrb[24].mxu0 %vm635_vm3, %v4657_v63 }
 0x10d   : > { %3471 = vmatprep.mubr.msk.bf16.mxu1 %vm635_vm3, %v4827_v40  ;;  %3623 = vmatprep.mubr.msk.bf16.mxu0 %vm635_vm3, %v4835_v16 }
 0x114   : > { %3472 = vmatmul.mubr.msk.bf16.gmra.mrb[12].mxu1 %vm635_vm3, %v4723_v22  ;;  %3624 = vmatmul.mubr.msk.bf16.gmra.mrb[28].mxu0 %vm635_vm3, %v3160_v17 }
 0x115   : > { %3475 = vmatprep.mubr.msk.bf16.mxu1 %vm635_vm3, %v4733_v57  ;;  %3629 = vmatprep.mubr.msk.bf16.mxu0 %vm635_vm3, %v5230_v52 }
 0x11c   : > { %3476 = vmatmul.mubr.msk.bf16.gmra.mrb[16].mxu1 %vm635_vm3, %v4742_v5  ;;  %3630 = vmatmul.mubr.msk.bf16.vlgmr.msra.gmra.mrb[0].mxu0 %vm635_vm3, %v5231_v3 }
 0x11d   : > { %3479 = vmatprep.mubr.msk.bf16.mxu1 %vm635_vm3, %v4746_v49  ;;  %3633 = vmatprep.mubr.msk.bf16.mxu0 %vm635_vm3, %v5232_v4 }
 0x124   : > { %3480 = vmatmul.mubr.msk.bf16.gmra.mrb[20].mxu1 %vm635_vm3, %v4750_v54  ;;  %3634 = vmatmul.mubr.msk.bf16.gmra.mrb[4].mxu0 %vm635_vm3, %v5233_v21 }
 0x125   : > { %3483 = vmatprep.mubr.msk.bf16.mxu1 %vm635_vm3, %v4754_v36  ;;  %3637 = vmatprep.mubr.msk.bf16.mxu0 %vm635_vm3, %v5234_v13 }
 0x12c   : > { %3484 = vmatmul.mubr.msk.bf16.gmra.mrb[24].mxu1 %vm635_vm3, %v4758_v45  ;;  %3638 = vmatmul.mubr.msk.bf16.gmra.mrb[8].mxu0 %vm635_vm3, %v4628_v37  ;;  %v3177_v37 = vrot.slane %v4924_v24, 9 }
 0x12d   : > { %3487 = vmatprep.mubr.msk.bf16.mxu1 %vm635_vm3, %v4768_v29  ;;  %3641 = vmatprep.mubr.msk.bf16.mxu0 %vm635_vm3, %v4659_v41  ;;  %v2651_v41 = vrot.slane %v2649_v34, 4 }
 0x134   : > { %3488 = vmatmul.mubr.msk.bf16.gmra.mrb[28].mxu1 %vm635_vm3, %v4913_v11  ;;  %3642 = vmatmul.mubr.msk.bf16.gmra.mrb[12].mxu0 %vm635_vm3, %v4663_v50  ;;  %v2652_v50 = vrot.slane %v196_v55, 5 }
 0x135   : > { %3509 = vmatprep.mubr.msk.bf16.mxu1 %vm635_vm3, %v5242_v27  ;;  %3645 = vmatprep.mubr.msk.bf16.mxu0 %vm635_vm3, %v4685_v20  ;;  %v2650_v20 = vsel %vm4377_vm7, %v3177_v37, %v2649_v34 }
 0x13c   : > { %3510 = vmatmul.mubr.msk.bf16.vlgmr.msra.gmra.mrb[16].mxu1 %vm635_vm3, %v5243_v6  ;;  %3646 = vmatmul.mubr.msk.bf16.gmra.mrb[16].mxu0 %vm635_vm3, %v4696_v0  ;;  %v2653_v0 = vsel %vm4377_vm7, %v2651_v41, %v2652_v50 }
 0x13d   : > { %3513 = vmatprep.mubr.msk.bf16.mxu1 %vm635_vm3, %v5244_v7  ;;  %3649 = vmatprep.mubr.msk.bf16.mxu0 %vm635_vm3, %v4737_v62  ;;  %v3179_v22 = vcombine.low %v2650_v20, %v2653_v0 }
 0x144   : > { %3514 = vmatmul.mubr.msk.bf16.gmra.mrb[20].mxu1 %vm635_vm3, %v5246_v46  ;;  %3650 = vmatmul.mubr.msk.bf16.gmra.mrb[20].mxu0 %vm635_vm3, %v4764_v31 }
 0x145   : > { %3517 = vmatprep.mubr.msk.bf16.mxu1 %vm635_vm3, %v5247_v12  ;;  %3653 = vmatprep.mubr.msk.bf16.mxu0 %vm635_vm3, %v4800_v44 }
 0x14c   : > { %3518 = vmatmul.mubr.msk.bf16.gmra.mrb[24].mxu1 %vm635_vm3, %v4630_v30  ;;  %3654 = vmatmul.mubr.msk.bf16.gmra.mrb[24].mxu0 %vm635_vm3, %v4810_v1 }
 0x14d   : > { %3521 = vmatprep.mubr.msk.bf16.mxu1 %vm635_vm3, %v4657_v63  ;;  %3657 = vmatprep.mubr.msk.bf16.mxu0 %vm635_vm3, %v4829_v19 }
 0x154   : > { %3522 = vmatmul.mubr.msk.bf16.gmra.mrb[28].mxu1 %vm635_vm3, %v4835_v16  ;;  %3658 = vmatmul.mubr.msk.bf16.gmra.mrb[28].mxu0 %vm635_vm3, %v3179_v22 }
 0x1cf   : > { %v3461_v30 = vpop.f32.mrb[0].mxu1 }
 0x1d0   : > { %v1613_v57 = vpop.f32.mrb[1].mxu1 }
 0x1d1   : > { %v3462_v63 = vpop.f32.mrb[2].mxu1 }
 0x1d2   : > { %v1616_v62 = vpop.f32.mrb[3].mxu1 }
 0x1d7   : > { %v3465_v5 = vpop.f32.mrb[4].mxu1 }
 0x1d8   : > { %v1629_v49 = vpop.f32.mrb[5].mxu1 }
 0x1d9   : > { %v3466_v54 = vpop.f32.mrb[6].mxu1 }
 0x1da   : > { %v1632_v36 = vpop.f32.mrb[7].mxu1 }
 0x1df   : > { %v3469_v45 = vpop.f32.mrb[8].mxu1 }
 0x1e0   : > { %v1645_v31 = vpop.f32.mrb[9].mxu1 }
 0x1e1   : > { %v3470_v26 = vpop.f32.mrb[10].mxu1 }
 0x1e2   : > { %v1648_v29 = vpop.f32.mrb[11].mxu1 }
 0x1e7   : > { %v3473_v44 = vpop.f32.mrb[12].mxu1 }
 0x1e8   : > { %v1661_v8 = vpop.f32.mrb[13].mxu1 }
 0x1e9   : > { %v3474_v1 = vpop.f32.mrb[14].mxu1 }
 0x1ea   : > { %v1664_v40 = vpop.f32.mrb[15].mxu1 }
 0x1ef   : > { %v3631_v19 = vpop.f32.mrb[0].mxu0 }
 0x1f0   : > { %v3663_v16 = vadd.f32 %v3631_v19, %v3461_v30  ;;  %v2699_v52 = vpop.f32.mrb[1].mxu0 }
 0x1f1   : > { %v3664_v3 = vadd.f32 %v2699_v52, %v1613_v57  ;;  %v3632_v4 = vpop.f32.mrb[2].mxu0 }
 0x1f2   : > { %2860 = vst [vmem:[%s5080_s29 + $0x10] sm:$0xff] %v3663_v16  ;;  %v3665_v11 = vadd.f32 %v3632_v4, %v3462_v63  ;;  %v2702_v21 = vpop.f32.mrb[3].mxu0 }
 0x1f3   : > { %2858 = vst [vmem:[%s5080_s29] sm:$0xff] %v3664_v3  ;;  %v3666_v13 = vadd.f32 %v2702_v21, %v1616_v62 }
 0x1f4   : > { %2861 = vst [vmem:[%s5080_s29 + $0x18] sm:$0xff] %v3665_v11 }
 0x1f5   : > { %2859 = vst [vmem:[%s5080_s29 + $0x8] sm:$0xff] %v3666_v13 }
 0x1f7   : > { %v3635_v24 = vpop.f32.mrb[4].mxu0 }
 0x1f8   : > { %v3667_v9 = vadd.f32 %v3635_v24, %v3465_v5  ;;  %v2715_v10 = vpop.f32.mrb[5].mxu0 }
 0x1f9   : > { %v3668_v51 = vadd.f32 %v2715_v10, %v1629_v49  ;;  %v3636_v33 = vpop.f32.mrb[6].mxu0 }
 0x1fa   : > { %2864 = vst [vmem:[%s5080_s29 + $0x30] sm:$0xff] %v3667_v9  ;;  %v3669_v39 = vadd.f32 %v3636_v33, %v3466_v54  ;;  %v2718_v58 = vpop.f32.mrb[7].mxu0 }
 0x1fb   : > { %2862 = vst [vmem:[%s5080_s29 + $0x20] sm:$0xff] %v3668_v51  ;;  %v3670_v42 = vadd.f32 %v2718_v58, %v1632_v36 }
 0x1fc   : > { %2865 = vst [vmem:[%s5080_s29 + $0x38] sm:$0xff] %v3669_v39 }
 0x1fd   : > { %2863 = vst [vmem:[%s5080_s29 + $0x28] sm:$0xff] %v3670_v42 }
 0x1ff   : > { %v3639_v15 = vpop.f32.mrb[8].mxu0 }
 0x200   : > { %v3671_v27 = vadd.f32 %v3639_v15, %v3469_v45  ;;  %v2731_v6 = vpop.f32.mrb[9].mxu0 }
 0x201   : > { %v3672_v7 = vadd.f32 %v2731_v6, %v1645_v31  ;;  %v3640_v60 = vpop.f32.mrb[10].mxu0 }
 0x202   : > { %2868 = vst [vmem:[%s5080_s29 + $0x50] sm:$0xff] %v3671_v27  ;;  %v3673_v14 = vadd.f32 %v3640_v60, %v3470_v26  ;;  %v2734_v28 = vpop.f32.mrb[11].mxu0 }
 0x203   : > { %2866 = vst [vmem:[%s5080_s29 + $0x40] sm:$0xff] %v3672_v7  ;;  %v3674_v25 = vadd.f32 %v2734_v28, %v1648_v29 }
 0x204   : > { %2869 = vst [vmem:[%s5080_s29 + $0x58] sm:$0xff] %v3673_v14 }
 0x205   : > { %2867 = vst [vmem:[%s5080_s29 + $0x48] sm:$0xff] %v3674_v25 }
 0x207   : > { %v3643_v38 = vpop.f32.mrb[12].mxu0 }
 0x208   : > { %v3675_v46 = vadd.f32 %v3643_v38, %v3473_v44  ;;  %v2747_v47 = vpop.f32.mrb[13].mxu0 }
 0x209   : > { %v3676_v32 = vadd.f32 %v2747_v47, %v1661_v8  ;;  %v3644_v18 = vpop.f32.mrb[14].mxu0 }
 0x20a   : > { %2872 = vst [vmem:[%s5080_s29 + $0x70] sm:$0xff] %v3675_v46  ;;  %v3677_v43 = vadd.f32 %v3644_v18, %v3474_v1  ;;  %v2750_v55 = vpop.f32.mrb[15].mxu0 }
 0x20b   : > { %2870 = vst [vmem:[%s5080_s29 + $0x60] sm:$0xff] %v3676_v32  ;;  %v3678_v12 = vadd.f32 %v2750_v55, %v1664_v40 }
 0x20c   : > { %2873 = vst [vmem:[%s5080_s29 + $0x78] sm:$0xff] %v3677_v43 }
 0x20d   : > { %2871 = vst [vmem:[%s5080_s29 + $0x68] sm:$0xff] %v3678_v12 }
 0x20f   : > { %v3511_v23 = vpop.f32.mrb[16].mxu1  ;;  %v3647_v59 = vpop.f32.mrb[16].mxu0 }
 0x210   : > { %v3679_v35 = vadd.f32 %v3647_v59, %v3511_v23  ;;  %v1905_v48 = vpop.f32.mrb[17].mxu1  ;;  %v2763_v2 = vpop.f32.mrb[17].mxu0 }
 0x211   : > { %v3680_v61 = vadd.f32 %v2763_v2, %v1905_v48  ;;  %v3512_v56 = vpop.f32.mrb[18].mxu1  ;;  %v3648_v53 = vpop.f32.mrb[18].mxu0 }
 0x212   : > { %2876 = vst [vmem:[%s5080_s29 + $0x90] sm:$0xff] %v3679_v35  ;;  %v3681_v17 = vadd.f32 %v3648_v53, %v3512_v56  ;;  %v1908_v34 = vpop.f32.mrb[19].mxu1  ;;  %v2766_v37 = vpop.f32.mrb[19].mxu0 }
 0x213   : > { %2874 = vst [vmem:[%s5080_s29 + $0x80] sm:$0xff] %v3680_v61  ;;  %v3682_v41 = vadd.f32 %v2766_v37, %v1908_v34 }
 0x214   : > { %2877 = vst [vmem:[%s5080_s29 + $0x98] sm:$0xff] %v3681_v17 }
 0x215   : > { %2875 = vst [vmem:[%s5080_s29 + $0x88] sm:$0xff] %v3682_v41 }
 0x217   : > { %v3515_v50 = vpop.f32.mrb[20].mxu1  ;;  %v3651_v20 = vpop.f32.mrb[20].mxu0 }
 0x218   : > { %v3683_v0 = vadd.f32 %v3651_v20, %v3515_v50  ;;  %v1921_v22 = vpop.f32.mrb[21].mxu1  ;;  %v2779_v30 = vpop.f32.mrb[21].mxu0 }
 0x219   : > { %v3684_v57 = vadd.f32 %v2779_v30, %v1921_v22  ;;  %v3516_v63 = vpop.f32.mrb[22].mxu1  ;;  %v3652_v62 = vpop.f32.mrb[22].mxu0 }
 0x21a   : > { %2880 = vst [vmem:[%s5080_s29 + $0xb0] sm:$0xff] %v3683_v0  ;;  %v3685_v5 = vadd.f32 %v3652_v62, %v3516_v63  ;;  %v1924_v49 = vpop.f32.mrb[23].mxu1  ;;  %v2782_v54 = vpop.f32.mrb[23].mxu0 }
 0x21b   : > { %2878 = vst [vmem:[%s5080_s29 + $0xa0] sm:$0xff] %v3684_v57  ;;  %v3686_v36 = vadd.f32 %v2782_v54, %v1924_v49 }
 0x21c   : > { %2881 = vst [vmem:[%s5080_s29 + $0xb8] sm:$0xff] %v3685_v5 }
 0x21d   : > { %2879 = vst [vmem:[%s5080_s29 + $0xa8] sm:$0xff] %v3686_v36 }
 0x21f   : > { %v3519_v45 = vpop.f32.mrb[24].mxu1  ;;  %v3655_v31 = vpop.f32.mrb[24].mxu0 }
 0x220   : > { %v3687_v26 = vadd.f32 %v3655_v31, %v3519_v45  ;;  %v1937_v29 = vpop.f32.mrb[25].mxu1  ;;  %v2795_v44 = vpop.f32.mrb[25].mxu0 }
 0x221   : > { %v3688_v8 = vadd.f32 %v2795_v44, %v1937_v29  ;;  %v3520_v1 = vpop.f32.mrb[26].mxu1  ;;  %v3656_v40 = vpop.f32.mrb[26].mxu0 }
 0x222   : > { %2884 = vst [vmem:[%s5080_s29 + $0xd0] sm:$0xff] %v3687_v26  ;;  %v3689_v19 = vadd.f32 %v3656_v40, %v3520_v1  ;;  %v1940_v16 = vpop.f32.mrb[27].mxu1  ;;  %v2798_v52 = vpop.f32.mrb[27].mxu0 }
 0x223   : > { %2882 = vst [vmem:[%s5080_s29 + $0xc0] sm:$0xff] %v3688_v8  ;;  %v3690_v3 = vadd.f32 %v2798_v52, %v1940_v16 }
 0x224   : > { %2885 = vst [vmem:[%s5080_s29 + $0xd8] sm:$0xff] %v3689_v19 }
 0x225   : > { %2883 = vst [vmem:[%s5080_s29 + $0xc8] sm:$0xff] %v3690_v3 }
 0x227   : > { %v3523_v4 = vpop.f32.mrb[28].mxu1  ;;  %v3659_v11 = vpop.f32.mrb[28].mxu0 }
 0x228   : > { %v3691_v21 = vadd.f32 %v3659_v11, %v3523_v4  ;;  %v1953_v13 = vpop.f32.mrb[29].mxu1  ;;  %v2811_v24 = vpop.f32.mrb[29].mxu0 }
 0x229   : > { %v3692_v9 = vadd.f32 %v2811_v24, %v1953_v13  ;;  %v3524_v10 = vpop.f32.mrb[30].mxu1  ;;  %v3660_v51 = vpop.f32.mrb[30].mxu0 }
 0x22a   : > { %2888 = vst [vmem:[%s5080_s29 + $0xf0] sm:$0xff] %v3691_v21  ;;  %v3693_v33 = vadd.f32 %v3660_v51, %v3524_v10  ;;  %v1956_v39 = vpop.f32.mrb[31].mxu1  ;;  %v2814_v58 = vpop.f32.mrb[31].mxu0 }
 0x22b   : > { %2886 = vst [vmem:[%s5080_s29 + $0xe0] sm:$0xff] %v3692_v9  ;;  %v3694_v42 = vadd.f32 %v2814_v58, %v1956_v39 }
 0x22c   : > { %2889 = vst [vmem:[%s5080_s29 + $0xf8] sm:$0xff] %v3693_v33 }
 0x22d   : > { %2887 = vst [vmem:[%s5080_s29 + $0xe8] sm:$0xff] %v3694_v42 }
 0x22e   : > { %4006 = shalt.err (!%p4003_p3)
}
 0x22f   : > { %s4007_s17 = scalar_lea.hbm %s5116_s6, 4096  ;;  %s4011_s23 = scalar_lea.hbm %s5168_s2, 8192 }
 0x230   : > { %p4008_p4 = scmp.ne.s32.totalorder %s5116_s6, %s4007_s17  ;;  %p4012_p9 = scmp.lt.u32.totalorder %s5116_s6, %s5168_s2 }
 0x231   : > { %p4013_p10 = scmp.lt.u32.totalorder %s4011_s23, %s4007_s17  ;;  %p4015_p12 = scmp.lt.u32.totalorder %s4007_s17, %s5116_s6 }
 0x232   : > { %p4009_p7 = pnand %p4008_p4, %p4113_p5 }
 0x233   : > { %p4014_p11 = por %p4013_p10, %p4012_p9 }
 0x234   : > { %p4010_p8 = pneg %p4009_p7 }
 0x235   : > { %p4016_p13 = por %p4015_p12, %p4014_p11 }
 0x237   : > { %p4017_p0 = pnand %p4016_p13, %p4010_p8 }
 0x239   : > { %4020 = shalt.err (!%p4017_p0)
}
 0x23a   : > { %s4058_s26 = smov 128   ;;  %s4059_s27 = smov 8  }
 0x23b   : > { %3930 = dma.vmem_to_hbm [thread:$0]  (%p4113_p5), %s5118_s3, 4096, %s5116_s6, %s5125_s13, %s4058_s26, %s4058_s26, %s4059_s27  }
 0x23c PF: > { %p3936_p1 = scmp.ge.s32.totalorder %s4055_s12, 2  ;;  %s2919_s28 = sand.u32 1, %s4043_s9  }
 0x23d   : > { %s2920_s29 = scalar_lea.sflag [#allocation3], %s2919_s28 }
 0x23e   : > { %p3933_p2 = pnand %p3936_p1, %p4117_p6 }
 0x240   : > { %4038 = dma.done.wait (!%p3933_p2), %s2920_s29, 4096  }
 0x241   : > { %4040 = vsyncadd (!%p3933_p2), %s2920_s29, 4294963200  ;;  %p12_p3 = scmp.ge.s32.totalorder %s4100_s15, 4   ;;  %s5248_s9 = smov %s4047_s10 }
 0x242   : > { %s5249_s10 = smov %s4051_s11  ;;  %s5250_s11 = smov %s4111_s18 }
 0x243   : > { %s5251_s12 = smov %s4100_s15  ;;  %14 = sbr.rel (!%p12_p3) target bundleno = 3 (0x3), region = 71 }
 0x24a   :  { %2925 = vsyncpa [#allocation3], 1 }
 0x24b   :  { %2927 = vsyncpa [#allocation3 + $0x1], 1 }

</bundles_post_ra>
